<compile_context>
chip_gen: v7x
topology: tpu7x:2x2x1
jax: 0.10.0
libtpu: 0.0.40
codegen_flags: <defaults>
</compile_context>

<pallas_src>
import functools

import jax
import jax.numpy as jnp
from jax.experimental import pallas as pl
from jax.experimental.pallas import tpu as pltpu


# ----------------------------------------------------------------------------- kernel
def _fused_basic_conv_layer_kernel(
    x_ref,        # (Cin, M)          input activations, M = N*H*W (lane-dense)
    masks_ref,    # (k*k, M)          per-tap border masks (1.0 inside, 0.0 at zero-pad)
    w1_ref,       # (C1, k*k*Cin)     stage-1 conv weight in im2col-matmul layout
    g1_ref,       # (C1, 1)           BN1 gamma
    be1_ref,      # (C1, 1)           BN1 beta
    w2_ref,       # (C2, k*k*C1)      stage-2 conv weight
    g2_ref,       # (C2, 1)           BN2 gamma
    be2_ref,      # (C2, 1)           BN2 beta
    out_ref,      # (C2, M)           lane-dense output (NCHW restored in wrapper)
    patch1_scr,   # (k*k*Cin, M)      VMEM im2col slab, stage 1
    patch2_scr,   # (k*k*C1, M)       VMEM im2col slab, stage 2
    *, k, W, compute_dtype,
):
    p = k // 2
    M = out_ref.shape[1]

    def conv_bn_relu(x, w_ref, g_ref, be_ref, patch_scr):
        cin = x.shape[0]

        # ---- im2col into a lane-dense (k*k*cin, M) VMEM slab ------------------
        # A tap (kh, kw) needs, for output pixel j = n*H*W + h*W + w, the value
        # x[:, j + d] with d = (kh-p)*W + (kw-p), masked to zero where the true
        # 2-D neighbour (h+kh-p, w+kw-p) falls in the zero padding.  Zeroing the
        # scratch once covers the masked halo columns.
        patch_scr[...] = jnp.zeros(patch_scr.shape, patch_scr.dtype)
        for kh in range(k):
            for kw in range(k):
                t = kh * k + kw
                d = (kh - p) * W + (kw - p)     # flat column shift of this tap
                j0 = max(0, -d)                 # first output column with in-range source
                L = M - abs(d)
                src = x[:, j0 + d:j0 + d + L]               # (cin, L)
                msk = masks_ref[t:t + 1, j0:j0 + L]         # (1, L)
                patch_scr[t * cin:(t + 1) * cin, j0:j0 + L] = src * msk

        # ---- single MXU contraction: (cout, k*k*cin) @ (k*k*cin, M) -----------
        acc = jnp.dot(w_ref[...].astype(compute_dtype),
                      patch_scr[...].astype(compute_dtype),
                      preferred_element_type=jnp.float32)    # (cout, M), lane-dense
        # Conv bias intentionally omitted: training-mode BatchNorm subtracts the
        # per-channel mean, so a per-channel conv bias cannot affect the output.

        # ---- BatchNorm2d training forward (stats over N*H*W = lane axis) ------
        mean = jnp.mean(acc, axis=1, keepdims=True)          # (cout, 1)
        cen = acc - mean
        var = jnp.mean(cen * cen, axis=1, keepdims=True)     # biased variance
        y = cen * jax.lax.rsqrt(var + 1e-5) * g_ref[...] + be_ref[...]

        # ---- ReLU --------------------------------------------------------------
        return jnp.maximum(y, 0.0)                            # (cout, M)

    # Stage 1, then stage 2 fused: the intermediate activation never leaves VMEM.
    y1 = conv_bn_relu(x_ref[...], w1_ref, g1_ref, be1_ref, patch1_scr)   # (C1, M)
    y2 = conv_bn_relu(y1, w2_ref, g2_ref, be2_ref, patch2_scr)           # (C2, M)
    out_ref[...] = y2.astype(out_ref.dtype)


# ----------------------------------------------------------------------------- helpers
def _tap_masks(k, N, H, W):
    """(k*k, N*H*W) f32 masks: 1 where a tap reads a real pixel, 0 where it reads pad."""
    p = k // 2
    h = jnp.arange(H, dtype=jnp.int32)
    w = jnp.arange(W, dtype=jnp.int32)
    rows = []
    for kh in range(k):
        for kw in range(k):
            dh, dw = kh - p, kw - p
            mh = ((h + dh) >= 0) & ((h + dh) < H)
            mw = ((w + dw) >= 0) & ((w + dw) < W)
            m = (mh[:, None] & mw[None, :]).astype(jnp.float32).reshape(H * W)
            rows.append(jnp.tile(m, N))            # column order: n-major, then h, w
    return jnp.stack(rows, axis=0)


def _conv_weight_to_matmul(w_oihw):
    """PyTorch OIHW conv weight -> (Cout, k*k*Cin), column order (kh, kw, cin)."""
    cout, cin, kh, kw = w_oihw.shape
    return jnp.transpose(w_oihw, (0, 2, 3, 1)).reshape(cout, kh * kw * cin)


def init_basic_conv_layer_params(key, in_size, out_size, kernel_size):
    """Synthetic parameters matching nn.Conv2d (OIHW) / nn.BatchNorm2d shapes."""
    k = kernel_size
    keys = jax.random.split(key, 4)

    def conv_init(kw_key, kb_key, cin, cout):
        bound = float((cin * k * k) ** -0.5)
        w = jax.random.uniform(kw_key, (cout, cin, k, k), jnp.float32, -bound, bound)
        b = jax.random.uniform(kb_key, (cout,), jnp.float32, -bound, bound)
        return w, b

    w1, b1 = conv_init(keys[0], keys[1], in_size, out_size)
    w2, b2 = conv_init(keys[2], keys[3], out_size, out_size)
    # BatchNorm2d default affine init: gamma=1, beta=0.  (Conv biases are kept for
    # parity with the PyTorch module but are no-ops under training-mode BN, so the
    # kernel does not consume them.)
    return dict(w1=w1, b1=b1, g1=jnp.ones((out_size,), jnp.float32),
                be1=jnp.zeros((out_size,), jnp.float32),
                w2=w2, b2=b2, g2=jnp.ones((out_size,), jnp.float32),
                be2=jnp.zeros((out_size,), jnp.float32))


# ----------------------------------------------------------------------------- wrapper
@functools.partial(jax.jit, static_argnames=("kernel_size", "use_bf16_mxu"))
def basic_conv_layer_forward(x_nchw, params, kernel_size, use_bf16_mxu=False):
    """Forward of basic_conv_layer. Input/output in PyTorch NCHW layout."""
    k = kernel_size
    N, Cin, H, W = x_nchw.shape
    C1 = params["w1"].shape[0]
    C2 = params["w2"].shape[0]
    M = N * H * W

    # --- VMEM budget guard (single fused block; v7x has 64 MiB physical VMEM) ---
    f32b = 4
    vmem_est = f32b * (Cin * M + k * k * M + C2 * M                    # x, masks, out
                       + C1 * k * k * Cin + C2 * k * k * C1            # weights
                       + 2 * (C1 + C2)                                 # BN params
                       + k * k * Cin * M + k * k * C1 * M              # im2col slabs
                       + 2 * (C1 + C2) * M)                            # activations/acc
    if vmem_est > 24 * 1024 * 1024:
        # TODO(synk): add a batch/spatial-tiled grid with halo blocks and a two-pass
        # BatchNorm (resident sum/sumsq accumulators via pl.when) so large shapes
        # pipeline HBM<->VMEM and shard across v7x's two TensorCores.
        raise NotImplementedError("working set exceeds single-block VMEM budget")

    # Wrapper-side layout plumbing (cheap XLA transposes/reshapes, not compute).
    x_flat = jnp.transpose(x_nchw.astype(jnp.float32), (1, 0, 2, 3)).reshape(Cin, M)
    masks = _tap_masks(k, N, H, W)
    w1m = _conv_weight_to_matmul(params["w1"].astype(jnp.float32))
    w2m = _conv_weight_to_matmul(params["w2"].astype(jnp.float32))
    g1 = params["g1"].reshape(C1, 1).astype(jnp.float32)
    be1 = params["be1"].reshape(C1, 1).astype(jnp.float32)
    g2 = params["g2"].reshape(C2, 1).astype(jnp.float32)
    be2 = params["be2"].reshape(C2, 1).astype(jnp.float32)

    compute_dtype = jnp.bfloat16 if use_bf16_mxu else jnp.float32
    vmem = pl.BlockSpec(memory_space=pltpu.MemorySpace.VMEM)

    out_flat = pl.pallas_call(
        functools.partial(_fused_basic_conv_layer_kernel,
                          k=k, W=W, compute_dtype=compute_dtype),
        out_shape=jax.ShapeDtypeStruct((C2, M), jnp.float32),
        in_specs=[vmem] * 8,
        out_specs=vmem,
        scratch_shapes=[
            pltpu.VMEM((k * k * Cin, M), jnp.float32),
            pltpu.VMEM((k * k * C1, M), jnp.float32),
        ],
        compiler_params=pltpu.CompilerParams(vmem_limit_bytes=32 * 1024 * 1024),
    )(x_flat, masks, w1m, g1, be1, w2m, g2, be2)

    # (C2, N*H*W) lane-dense kernel output -> NCHW.
    return jnp.transpose(out_flat.reshape(C2, N, H, W), (1, 0, 2, 3))


# ----------------------------------------------------------------------------- reference
def _reference_forward(x_nchw, params, k):
    """Pure-JAX reference: Conv2d(+bias) -> BN(training stats) -> ReLU, twice."""
    p = k // 2

    def stage(x, w, b, g, be):
        y = jax.lax.conv_general_dilated(
            x, w, window_strides=(1, 1), padding=((p, p), (p, p)),
            dimension_numbers=("NCHW", "OIHW", "NCHW"))
        y = y + b.reshape(1, -1, 1, 1)
        mean = jnp.mean(y, axis=(0, 2, 3), keepdims=True)
        var = jnp.mean(jnp.square(y - mean), axis=(0, 2, 3), keepdims=True)
        y = (y - mean) * jax.lax.rsqrt(var + 1e-5)
        y = y * g.reshape(1, -1, 1, 1) + be.reshape(1, -1, 1, 1)
        return jnp.maximum(y, 0.0)

    y = stage(x_nchw.astype(jnp.float32), params["w1"], params["b1"],
              params["g1"], params["be1"])
    return stage(y, params["w2"], params["b2"], params["g2"], params["be2"])


# ----------------------------------------------------------------------------- main
if __name__ == "__main__":
    # Small shapes consistent with the module: batch=2, in=4, out=8, k=3, spatial=16.
    N, Cin, Cout, H, W, K = 2, 4, 8, 16, 16, 3

    key = jax.random.PRNGKey(0)
    kx, kp = jax.random.split(key)
    x = jax.random.normal(kx, (N, Cin, H, W), jnp.float32)
    params = init_basic_conv_layer_params(kp, Cin, Cout, K)

    out = basic_conv_layer_forward(x, params, K)
    jax.block_until_ready(out)

    assert out.shape == (N, Cout, H, W), out.shape
    assert out.dtype == jnp.float32
    assert bool(jnp.all(jnp.isfinite(out)))
    assert bool(jnp.all(out >= 0.0))  # ReLU output

    # Correctness vs pure-JAX reference.  Loose tolerance catches layout / shift /
    # mask bugs (O(1) errors) while allowing MXU f32-pass rounding differences.
    ref = _reference_forward(x, params, K)
    max_err = float(jnp.max(jnp.abs(out - ref)))
    assert max_err < 5e-2, f"max abs error vs reference: {max_err}"

    print("KERNEL_OK")
</pallas_src>

<mosaic_0001>
module attributes {stable_mosaic.version = 11 : i64} {
  func.func @_fused_basic_conv_layer_kernel(%arg0: memref<4x512xf32, #tpu.memory_space<vmem>>, %arg1: memref<9x512xf32, #tpu.memory_space<vmem>>, %arg2: memref<8x36xf32, #tpu.memory_space<vmem>>, %arg3: memref<8x1xf32, #tpu.memory_space<vmem>>, %arg4: memref<8x1xf32, #tpu.memory_space<vmem>>, %arg5: memref<8x72xf32, #tpu.memory_space<vmem>>, %arg6: memref<8x1xf32, #tpu.memory_space<vmem>>, %arg7: memref<8x1xf32, #tpu.memory_space<vmem>>, %arg8: memref<8x512xf32, #tpu.memory_space<vmem>>, %arg9: memref<36x512xf32, #tpu.memory_space<vmem>>, %arg10: memref<72x512xf32, #tpu.memory_space<vmem>>) attributes {dimension_semantics = [], scalar_prefetch = 0 : i64, scratch_operands = 2 : i64, tpu.core_type = #tpu.core_type<tc>} {
    %c0 = arith.constant 0 : index
    %c0_0 = arith.constant 0 : index
    %0 = vector.load %arg0[%c0, %c0_0] : memref<4x512xf32, #tpu.memory_space<vmem>>, vector<4x512xf32>
    %cst = arith.constant 0.000000e+00 : f32
    %1 = vector.broadcast %cst : f32 to vector<36x512xf32>
    %c0_1 = arith.constant 0 : index
    %c0_2 = arith.constant 0 : index
    %2 = vector.load %arg9[%c0_1, %c0_2] : memref<36x512xf32, #tpu.memory_space<vmem>>, vector<36x512xf32>
    tpu.vector_store %arg9[%c0_1, %c0_2], %1 {strides = array<i32>} : memref<36x512xf32, #tpu.memory_space<vmem>>, vector<36x512xf32>,
    %3 = vector.extract_strided_slice %0 {offsets = [0, 0], sizes = [4, 495], strides = [1, 1]} : vector<4x512xf32> to vector<4x495xf32>
    %c0_3 = arith.constant 0 : index
    %c17 = arith.constant 17 : index
    %4 = vector.load %arg1[%c0_3, %c17] : memref<9x512xf32, #tpu.memory_space<vmem>>, vector<1x495xf32>
    %5 = vector.broadcast %4 : vector<1x495xf32> to vector<4x495xf32>
    %6 = arith.mulf %3, %5 : vector<4x495xf32>
    %c0_4 = arith.constant 0 : index
    %c17_5 = arith.constant 17 : index
    %7 = vector.load %arg9[%c0_4, %c17_5] : memref<36x512xf32, #tpu.memory_space<vmem>>, vector<4x495xf32>
    tpu.vector_store %arg9[%c0_4, %c17_5], %6 {strides = array<i32>} : memref<36x512xf32, #tpu.memory_space<vmem>>, vector<4x495xf32>,
    %8 = vector.extract_strided_slice %0 {offsets = [0, 0], sizes = [4, 496], strides = [1, 1]} : vector<4x512xf32> to vector<4x496xf32>
    %c1 = arith.constant 1 : index
    %c16 = arith.constant 16 : index
    %9 = vector.load %arg1[%c1, %c16] : memref<9x512xf32, #tpu.memory_space<vmem>>, vector<1x496xf32>
    %10 = vector.broadcast %9 : vector<1x496xf32> to vector<4x496xf32>
    %11 = arith.mulf %8, %10 : vector<4x496xf32>
    %c4 = arith.constant 4 : index
    %c16_6 = arith.constant 16 : index
    %12 = vector.load %arg9[%c4, %c16_6] : memref<36x512xf32, #tpu.memory_space<vmem>>, vector<4x496xf32>
    tpu.vector_store %arg9[%c4, %c16_6], %11 {strides = array<i32>} : memref<36x512xf32, #tpu.memory_space<vmem>>, vector<4x496xf32>,
    %13 = vector.extract_strided_slice %0 {offsets = [0, 0], sizes = [4, 497], strides = [1, 1]} : vector<4x512xf32> to vector<4x497xf32>
    %c2 = arith.constant 2 : index
    %c15 = arith.constant 15 : index
    %14 = vector.load %arg1[%c2, %c15] : memref<9x512xf32, #tpu.memory_space<vmem>>, vector<1x497xf32>
    %15 = vector.broadcast %14 : vector<1x497xf32> to vector<4x497xf32>
    %16 = arith.mulf %13, %15 : vector<4x497xf32>
    %c8 = arith.constant 8 : index
    %c15_7 = arith.constant 15 : index
    %17 = vector.load %arg9[%c8, %c15_7] : memref<36x512xf32, #tpu.memory_space<vmem>>, vector<4x497xf32>
    tpu.vector_store %arg9[%c8, %c15_7], %16 {strides = array<i32>} : memref<36x512xf32, #tpu.memory_space<vmem>>, vector<4x497xf32>,
    %18 = vector.extract_strided_slice %0 {offsets = [0, 0], sizes = [4, 511], strides = [1, 1]} : vector<4x512xf32> to vector<4x511xf32>
    %c3 = arith.constant 3 : index
    %c1_8 = arith.constant 1 : index
    %19 = vector.load %arg1[%c3, %c1_8] : memref<9x512xf32, #tpu.memory_space<vmem>>, vector<1x511xf32>
    %20 = vector.broadcast %19 : vector<1x511xf32> to vector<4x511xf32>
    %21 = arith.mulf %18, %20 : vector<4x511xf32>
    %c12 = arith.constant 12 : index
    %c1_9 = arith.constant 1 : index
    %22 = vector.load %arg9[%c12, %c1_9] : memref<36x512xf32, #tpu.memory_space<vmem>>, vector<4x511xf32>
    tpu.vector_store %arg9[%c12, %c1_9], %21 {strides = array<i32>} : memref<36x512xf32, #tpu.memory_space<vmem>>, vector<4x511xf32>,
    %c4_10 = arith.constant 4 : index
    %c0_11 = arith.constant 0 : index
    %23 = vector.load %arg1[%c4_10, %c0_11] : memref<9x512xf32, #tpu.memory_space<vmem>>, vector<1x512xf32>
    %24 = vector.broadcast %23 : vector<1x512xf32> to vector<4x512xf32>
    %25 = arith.mulf %0, %24 : vector<4x512xf32>
    %c16_12 = arith.constant 16 : index
    %c0_13 = arith.constant 0 : index
    %26 = vector.load %arg9[%c16_12, %c0_13] : memref<36x512xf32, #tpu.memory_space<vmem>>, vector<4x512xf32>
    tpu.vector_store %arg9[%c16_12, %c0_13], %25 {strides = array<i32>} : memref<36x512xf32, #tpu.memory_space<vmem>>, vector<4x512xf32>,
    %27 = vector.extract_strided_slice %0 {offsets = [0, 1], sizes = [4, 511], strides = [1, 1]} : vector<4x512xf32> to vector<4x511xf32>
    %c5 = arith.constant 5 : index
    %c0_14 = arith.constant 0 : index
    %28 = vector.load %arg1[%c5, %c0_14] : memref<9x512xf32, #tpu.memory_space<vmem>>, vector<1x511xf32>
    %29 = vector.broadcast %28 : vector<1x511xf32> to vector<4x511xf32>
    %30 = arith.mulf %27, %29 : vector<4x511xf32>
    %c20 = arith.constant 20 : index
    %c0_15 = arith.constant 0 : index
    %31 = vector.load %arg9[%c20, %c0_15] : memref<36x512xf32, #tpu.memory_space<vmem>>, vector<4x511xf32>
    tpu.vector_store %arg9[%c20, %c0_15], %30 {strides = array<i32>} : memref<36x512xf32, #tpu.memory_space<vmem>>, vector<4x511xf32>,
    %32 = vector.extract_strided_slice %0 {offsets = [0, 15], sizes = [4, 497], strides = [1, 1]} : vector<4x512xf32> to vector<4x497xf32>
    %c6 = arith.constant 6 : index
    %c0_16 = arith.constant 0 : index
    %33 = vector.load %arg1[%c6, %c0_16] : memref<9x512xf32, #tpu.memory_space<vmem>>, vector<1x497xf32>
    %34 = vector.broadcast %33 : vector<1x497xf32> to vector<4x497xf32>
    %35 = arith.mulf %32, %34 : vector<4x497xf32>
    %c24 = arith.constant 24 : index
    %c0_17 = arith.constant 0 : index
    %36 = vector.load %arg9[%c24, %c0_17] : memref<36x512xf32, #tpu.memory_space<vmem>>, vector<4x497xf32>
    tpu.vector_store %arg9[%c24, %c0_17], %35 {strides = array<i32>} : memref<36x512xf32, #tpu.memory_space<vmem>>, vector<4x497xf32>,
    %37 = vector.extract_strided_slice %0 {offsets = [0, 16], sizes = [4, 496], strides = [1, 1]} : vector<4x512xf32> to vector<4x496xf32>
    %c7 = arith.constant 7 : index
    %c0_18 = arith.constant 0 : index
    %38 = vector.load %arg1[%c7, %c0_18] : memref<9x512xf32, #tpu.memory_space<vmem>>, vector<1x496xf32>
    %39 = vector.broadcast %38 : vector<1x496xf32> to vector<4x496xf32>
    %40 = arith.mulf %37, %39 : vector<4x496xf32>
    %c28 = arith.constant 28 : index
    %c0_19 = arith.constant 0 : index
    %41 = vector.load %arg9[%c28, %c0_19] : memref<36x512xf32, #tpu.memory_space<vmem>>, vector<4x496xf32>
    tpu.vector_store %arg9[%c28, %c0_19], %40 {strides = array<i32>} : memref<36x512xf32, #tpu.memory_space<vmem>>, vector<4x496xf32>,
    %42 = vector.extract_strided_slice %0 {offsets = [0, 17], sizes = [4, 495], strides = [1, 1]} : vector<4x512xf32> to vector<4x495xf32>
    %c8_20 = arith.constant 8 : index
    %c0_21 = arith.constant 0 : index
    %43 = vector.load %arg1[%c8_20, %c0_21] : memref<9x512xf32, #tpu.memory_space<vmem>>, vector<1x495xf32>
    %44 = vector.broadcast %43 : vector<1x495xf32> to vector<4x495xf32>
    %45 = arith.mulf %42, %44 : vector<4x495xf32>
    %c32 = arith.constant 32 : index
    %c0_22 = arith.constant 0 : index
    %46 = vector.load %arg9[%c32, %c0_22] : memref<36x512xf32, #tpu.memory_space<vmem>>, vector<4x495xf32>
    tpu.vector_store %arg9[%c32, %c0_22], %45 {strides = array<i32>} : memref<36x512xf32, #tpu.memory_space<vmem>>, vector<4x495xf32>,
    %c0_23 = arith.constant 0 : index
    %c0_24 = arith.constant 0 : index
    %47 = vector.load %arg2[%c0_23, %c0_24] : memref<8x36xf32, #tpu.memory_space<vmem>>, vector<8x36xf32>
    %c0_25 = arith.constant 0 : index
    %c0_26 = arith.constant 0 : index
    %48 = vector.load %arg9[%c0_25, %c0_26] : memref<36x512xf32, #tpu.memory_space<vmem>>, vector<36x512xf32>
    %cst_27 = arith.constant dense<0.000000e+00> : vector<8x512xf32>
    %49 = tpu.matmul %47, %48, %cst_27 {dimension_numbers = #tpu.dot_dimension_numbers<[1], [0], [0], [1], [0, 0, 1, 1], [], []>} : vector<8x36xf32>, vector<36x512xf32>, vector<8x512xf32> -> vector<8x512xf32>
    %cst_28 = arith.constant dense<0.000000e+00> : vector<8xf32>
    %50 = vector.multi_reduction <add>, %49, %cst_28 [1] : vector<8x512xf32> to vector<8xf32>
    %51 = vector.shape_cast %50 : vector<8xf32> to vector<8x1xf32>
    %cst_29 = arith.constant 5.120000e+02 : f32
    %52 = vector.broadcast %cst_29 : f32 to vector<8x1xf32>
    %53 = arith.divf %51, %52 : vector<8x1xf32>
    %54 = vector.broadcast %53 : vector<8x1xf32> to vector<8x512xf32>
    %55 = arith.subf %49, %54 : vector<8x512xf32>
    %56 = arith.mulf %55, %55 : vector<8x512xf32>
    %cst_30 = arith.constant dense<0.000000e+00> : vector<8xf32>
    %57 = vector.multi_reduction <add>, %56, %cst_30 [1] : vector<8x512xf32> to vector<8xf32>
    %58 = vector.shape_cast %57 : vector<8xf32> to vector<8x1xf32>
    %cst_31 = arith.constant 5.120000e+02 : f32
    %59 = vector.broadcast %cst_31 : f32 to vector<8x1xf32>
    %60 = arith.divf %58, %59 : vector<8x1xf32>
    %cst_32 = arith.constant 9.99999974E-6 : f32
    %61 = vector.broadcast %cst_32 : f32 to vector<8x1xf32>
    %62 = arith.addf %60, %61 : vector<8x1xf32>
    %63 = math.rsqrt %62 : vector<8x1xf32>
    %64 = vector.broadcast %63 : vector<8x1xf32> to vector<8x512xf32>
    %65 = arith.mulf %55, %64 : vector<8x512xf32>
    %c0_33 = arith.constant 0 : index
    %c0_34 = arith.constant 0 : index
    %66 = vector.load %arg3[%c0_33, %c0_34] : memref<8x1xf32, #tpu.memory_space<vmem>>, vector<8x1xf32>
    %67 = vector.broadcast %66 : vector<8x1xf32> to vector<8x512xf32>
    %68 = arith.mulf %65, %67 : vector<8x512xf32>
    %c0_35 = arith.constant 0 : index
    %c0_36 = arith.constant 0 : index
    %69 = vector.load %arg4[%c0_35, %c0_36] : memref<8x1xf32, #tpu.memory_space<vmem>>, vector<8x1xf32>
    %70 = vector.broadcast %69 : vector<8x1xf32> to vector<8x512xf32>
    %71 = arith.addf %68, %70 : vector<8x512xf32>
    %cst_37 = arith.constant 0.000000e+00 : f32
    %72 = vector.broadcast %cst_37 : f32 to vector<8x512xf32>
    %73 = arith.maximumf %71, %72 : vector<8x512xf32>
    %cst_38 = arith.constant 0.000000e+00 : f32
    %74 = vector.broadcast %cst_38 : f32 to vector<72x512xf32>
    %c0_39 = arith.constant 0 : index
    %c0_40 = arith.constant 0 : index
    %75 = vector.load %arg10[%c0_39, %c0_40] : memref<72x512xf32, #tpu.memory_space<vmem>>, vector<72x512xf32>
    tpu.vector_store %arg10[%c0_39, %c0_40], %74 {strides = array<i32>} : memref<72x512xf32, #tpu.memory_space<vmem>>, vector<72x512xf32>,
    %76 = vector.extract_strided_slice %73 {offsets = [0, 0], sizes = [8, 495], strides = [1, 1]} : vector<8x512xf32> to vector<8x495xf32>
    %c0_41 = arith.constant 0 : index
    %c17_42 = arith.constant 17 : index
    %77 = vector.load %arg1[%c0_41, %c17_42] : memref<9x512xf32, #tpu.memory_space<vmem>>, vector<1x495xf32>
    %78 = vector.broadcast %77 : vector<1x495xf32> to vector<8x495xf32>
    %79 = arith.mulf %76, %78 : vector<8x495xf32>
    %c0_43 = arith.constant 0 : index
    %c17_44 = arith.constant 17 : index
    %80 = vector.load %arg10[%c0_43, %c17_44] : memref<72x512xf32, #tpu.memory_space<vmem>>, vector<8x495xf32>
    tpu.vector_store %arg10[%c0_43, %c17_44], %79 {strides = array<i32>} : memref<72x512xf32, #tpu.memory_space<vmem>>, vector<8x495xf32>,
    %81 = vector.extract_strided_slice %73 {offsets = [0, 0], sizes = [8, 496], strides = [1, 1]} : vector<8x512xf32> to vector<8x496xf32>
    %c1_45 = arith.constant 1 : index
    %c16_46 = arith.constant 16 : index
    %82 = vector.load %arg1[%c1_45, %c16_46] : memref<9x512xf32, #tpu.memory_space<vmem>>, vector<1x496xf32>
    %83 = vector.broadcast %82 : vector<1x496xf32> to vector<8x496xf32>
    %84 = arith.mulf %81, %83 : vector<8x496xf32>
    %c8_47 = arith.constant 8 : index
    %c16_48 = arith.constant 16 : index
    %85 = vector.load %arg10[%c8_47, %c16_48] : memref<72x512xf32, #tpu.memory_space<vmem>>, vector<8x496xf32>
    tpu.vector_store %arg10[%c8_47, %c16_48], %84 {strides = array<i32>} : memref<72x512xf32, #tpu.memory_space<vmem>>, vector<8x496xf32>,
    %86 = vector.extract_strided_slice %73 {offsets = [0, 0], sizes = [8, 497], strides = [1, 1]} : vector<8x512xf32> to vector<8x497xf32>
    %c2_49 = arith.constant 2 : index
    %c15_50 = arith.constant 15 : index
    %87 = vector.load %arg1[%c2_49, %c15_50] : memref<9x512xf32, #tpu.memory_space<vmem>>, vector<1x497xf32>
    %88 = vector.broadcast %87 : vector<1x497xf32> to vector<8x497xf32>
    %89 = arith.mulf %86, %88 : vector<8x497xf32>
    %c16_51 = arith.constant 16 : index
    %c15_52 = arith.constant 15 : index
    %90 = vector.load %arg10[%c16_51, %c15_52] : memref<72x512xf32, #tpu.memory_space<vmem>>, vector<8x497xf32>
    tpu.vector_store %arg10[%c16_51, %c15_52], %89 {strides = array<i32>} : memref<72x512xf32, #tpu.memory_space<vmem>>, vector<8x497xf32>,
    %91 = vector.extract_strided_slice %73 {offsets = [0, 0], sizes = [8, 511], strides = [1, 1]} : vector<8x512xf32> to vector<8x511xf32>
    %c3_53 = arith.constant 3 : index
    %c1_54 = arith.constant 1 : index
    %92 = vector.load %arg1[%c3_53, %c1_54] : memref<9x512xf32, #tpu.memory_space<vmem>>, vector<1x511xf32>
    %93 = vector.broadcast %92 : vector<1x511xf32> to vector<8x511xf32>
    %94 = arith.mulf %91, %93 : vector<8x511xf32>
    %c24_55 = arith.constant 24 : index
    %c1_56 = arith.constant 1 : index
    %95 = vector.load %arg10[%c24_55, %c1_56] : memref<72x512xf32, #tpu.memory_space<vmem>>, vector<8x511xf32>
    tpu.vector_store %arg10[%c24_55, %c1_56], %94 {strides = array<i32>} : memref<72x512xf32, #tpu.memory_space<vmem>>, vector<8x511xf32>,
    %c4_57 = arith.constant 4 : index
    %c0_58 = arith.constant 0 : index
    %96 = vector.load %arg1[%c4_57, %c0_58] : memref<9x512xf32, #tpu.memory_space<vmem>>, vector<1x512xf32>
    %97 = vector.broadcast %96 : vector<1x512xf32> to vector<8x512xf32>
    %98 = arith.mulf %73, %97 : vector<8x512xf32>
    %c32_59 = arith.constant 32 : index
    %c0_60 = arith.constant 0 : index
    %99 = vector.load %arg10[%c32_59, %c0_60] : memref<72x512xf32, #tpu.memory_space<vmem>>, vector<8x512xf32>
    tpu.vector_store %arg10[%c32_59, %c0_60], %98 {strides = array<i32>} : memref<72x512xf32, #tpu.memory_space<vmem>>, vector<8x512xf32>,
    %100 = vector.extract_strided_slice %73 {offsets = [0, 1], sizes = [8, 511], strides = [1, 1]} : vector<8x512xf32> to vector<8x511xf32>
    %c5_61 = arith.constant 5 : index
    %c0_62 = arith.constant 0 : index
    %101 = vector.load %arg1[%c5_61, %c0_62] : memref<9x512xf32, #tpu.memory_space<vmem>>, vector<1x511xf32>
    %102 = vector.broadcast %101 : vector<1x511xf32> to vector<8x511xf32>
    %103 = arith.mulf %100, %102 : vector<8x511xf32>
    %c40 = arith.constant 40 : index
    %c0_63 = arith.constant 0 : index
    %104 = vector.load %arg10[%c40, %c0_63] : memref<72x512xf32, #tpu.memory_space<vmem>>, vector<8x511xf32>
    tpu.vector_store %arg10[%c40, %c0_63], %103 {strides = array<i32>} : memref<72x512xf32, #tpu.memory_space<vmem>>, vector<8x511xf32>,
    %105 = vector.extract_strided_slice %73 {offsets = [0, 15], sizes = [8, 497], strides = [1, 1]} : vector<8x512xf32> to vector<8x497xf32>
    %c6_64 = arith.constant 6 : index
    %c0_65 = arith.constant 0 : index
    %106 = vector.load %arg1[%c6_64, %c0_65] : memref<9x512xf32, #tpu.memory_space<vmem>>, vector<1x497xf32>
    %107 = vector.broadcast %106 : vector<1x497xf32> to vector<8x497xf32>
    %108 = arith.mulf %105, %107 : vector<8x497xf32>
    %c48 = arith.constant 48 : index
    %c0_66 = arith.constant 0 : index
    %109 = vector.load %arg10[%c48, %c0_66] : memref<72x512xf32, #tpu.memory_space<vmem>>, vector<8x497xf32>
    tpu.vector_store %arg10[%c48, %c0_66], %108 {strides = array<i32>} : memref<72x512xf32, #tpu.memory_space<vmem>>, vector<8x497xf32>,
    %110 = vector.extract_strided_slice %73 {offsets = [0, 16], sizes = [8, 496], strides = [1, 1]} : vector<8x512xf32> to vector<8x496xf32>
    %c7_67 = arith.constant 7 : index
    %c0_68 = arith.constant 0 : index
    %111 = vector.load %arg1[%c7_67, %c0_68] : memref<9x512xf32, #tpu.memory_space<vmem>>, vector<1x496xf32>
    %112 = vector.broadcast %111 : vector<1x496xf32> to vector<8x496xf32>
    %113 = arith.mulf %110, %112 : vector<8x496xf32>
    %c56 = arith.constant 56 : index
    %c0_69 = arith.constant 0 : index
    %114 = vector.load %arg10[%c56, %c0_69] : memref<72x512xf32, #tpu.memory_space<vmem>>, vector<8x496xf32>
    tpu.vector_store %arg10[%c56, %c0_69], %113 {strides = array<i32>} : memref<72x512xf32, #tpu.memory_space<vmem>>, vector<8x496xf32>,
    %115 = vector.extract_strided_slice %73 {offsets = [0, 17], sizes = [8, 495], strides = [1, 1]} : vector<8x512xf32> to vector<8x495xf32>
    %c8_70 = arith.constant 8 : index
    %c0_71 = arith.constant 0 : index
    %116 = vector.load %arg1[%c8_70, %c0_71] : memref<9x512xf32, #tpu.memory_space<vmem>>, vector<1x495xf32>
    %117 = vector.broadcast %116 : vector<1x495xf32> to vector<8x495xf32>
    %118 = arith.mulf %115, %117 : vector<8x495xf32>
    %c64 = arith.constant 64 : index
    %c0_72 = arith.constant 0 : index
    %119 = vector.load %arg10[%c64, %c0_72] : memref<72x512xf32, #tpu.memory_space<vmem>>, vector<8x495xf32>
    tpu.vector_store %arg10[%c64, %c0_72], %118 {strides = array<i32>} : memref<72x512xf32, #tpu.memory_space<vmem>>, vector<8x495xf32>,
    %c0_73 = arith.constant 0 : index
    %c0_74 = arith.constant 0 : index
    %120 = vector.load %arg5[%c0_73, %c0_74] : memref<8x72xf32, #tpu.memory_space<vmem>>, vector<8x72xf32>
    %c0_75 = arith.constant 0 : index
    %c0_76 = arith.constant 0 : index
    %121 = vector.load %arg10[%c0_75, %c0_76] : memref<72x512xf32, #tpu.memory_space<vmem>>, vector<72x512xf32>
    %cst_77 = arith.constant dense<0.000000e+00> : vector<8x512xf32>
    %122 = tpu.matmul %120, %121, %cst_77 {dimension_numbers = #tpu.dot_dimension_numbers<[1], [0], [0], [1], [0, 0, 1, 1], [], []>} : vector<8x72xf32>, vector<72x512xf32>, vector<8x512xf32> -> vector<8x512xf32>
    %cst_78 = arith.constant dense<0.000000e+00> : vector<8xf32>
    %123 = vector.multi_reduction <add>, %122, %cst_78 [1] : vector<8x512xf32> to vector<8xf32>
    %124 = vector.shape_cast %123 : vector<8xf32> to vector<8x1xf32>
    %cst_79 = arith.constant 5.120000e+02 : f32
    %125 = vector.broadcast %cst_79 : f32 to vector<8x1xf32>
    %126 = arith.divf %124, %125 : vector<8x1xf32>
    %127 = vector.broadcast %126 : vector<8x1xf32> to vector<8x512xf32>
    %128 = arith.subf %122, %127 : vector<8x512xf32>
    %129 = arith.mulf %128, %128 : vector<8x512xf32>
    %cst_80 = arith.constant dense<0.000000e+00> : vector<8xf32>
    %130 = vector.multi_reduction <add>, %129, %cst_80 [1] : vector<8x512xf32> to vector<8xf32>
    %131 = vector.shape_cast %130 : vector<8xf32> to vector<8x1xf32>
    %cst_81 = arith.constant 5.120000e+02 : f32
    %132 = vector.broadcast %cst_81 : f32 to vector<8x1xf32>
    %133 = arith.divf %131, %132 : vector<8x1xf32>
    %cst_82 = arith.constant 9.99999974E-6 : f32
    %134 = vector.broadcast %cst_82 : f32 to vector<8x1xf32>
    %135 = arith.addf %133, %134 : vector<8x1xf32>
    %136 = math.rsqrt %135 : vector<8x1xf32>
    %137 = vector.broadcast %136 : vector<8x1xf32> to vector<8x512xf32>
    %138 = arith.mulf %128, %137 : vector<8x512xf32>
    %c0_83 = arith.constant 0 : index
    %c0_84 = arith.constant 0 : index
    %139 = vector.load %arg6[%c0_83, %c0_84] : memref<8x1xf32, #tpu.memory_space<vmem>>, vector<8x1xf32>
    %140 = vector.broadcast %139 : vector<8x1xf32> to vector<8x512xf32>
    %141 = arith.mulf %138, %140 : vector<8x512xf32>
    %c0_85 = arith.constant 0 : index
    %c0_86 = arith.constant 0 : index
    %142 = vector.load %arg7[%c0_85, %c0_86] : memref<8x1xf32, #tpu.memory_space<vmem>>, vector<8x1xf32>
    %143 = vector.broadcast %142 : vector<8x1xf32> to vector<8x512xf32>
    %144 = arith.addf %141, %143 : vector<8x512xf32>
    %cst_87 = arith.constant 0.000000e+00 : f32
    %145 = vector.broadcast %cst_87 : f32 to vector<8x512xf32>
    %146 = arith.maximumf %144, %145 : vector<8x512xf32>
    %c0_88 = arith.constant 0 : index
    %c0_89 = arith.constant 0 : index
    %147 = vector.load %arg8[%c0_88, %c0_89] : memref<8x512xf32, #tpu.memory_space<vmem>>, vector<8x512xf32>
    tpu.vector_store %arg8[%c0_88, %c0_89], %146 {strides = array<i32>} : memref<8x512xf32, #tpu.memory_space<vmem>>, vector<8x512xf32>,
    return
  }
}

</mosaic_0001>

<bundles_post_ra>
// kernel: basic_conv_layer_forward.1
= control target key start
LH: loop header
LB: loop body
LE: loop exit
PB: predicated region body
PF: predicated region fallthrough
CT: control target
= control target key end

     0   :  { %v53_v0 = vlaneseq  ;;  %s1667_s11 = smov 112   ;;  %s1668_s12 = smov 111   ;;  %vm79_vm0 = vcmask 908288   ;;  %vm139_vm1 = vcmask 916480   ;;  %vm199_vm2 = vcmask 924672   ;;  %s2359_s1 = inlined_call_operand.vmem [shape: f32[9,512], index: 1, kind: input, shape index: {}]   ;;  %s2360_s0 = inlined_call_operand.vmem [shape: f32[4,512], index: 0, kind: input, shape index: {}]   ;;  %s2361_s2 = inlined_call_operand.vmem [shape: f32[8,36], index: 2, kind: input, shape index: {}]   ;;  %s2362_s4 = inlined_call_operand.vmem [shape: f32[8,1], index: 4, kind: input, shape index: {}]   ;;  %s2363_s3 = inlined_call_operand.vmem [shape: f32[8,1], index: 3, kind: input, shape index: {}]   ;;  %s2364_s5 = inlined_call_operand.vmem [shape: f32[8,72], index: 5, kind: input, shape index: {}]   ;;  %s2365_s6 = inlined_call_operand.vmem [shape: f32[8,1], index: 6, kind: input, shape index: {}]   ;;  %s2366_s7 = inlined_call_operand.vmem [shape: f32[8,1], index: 7, kind: input, shape index: {}]   ;;  %s2367_s8 = inlined_call_operand.vmem [shape: f32[8,512], index: 8, kind: output, shape index: {}]  }
   0x1   :  { %v1579_v2 = vld [vmem:[%s2359_s1 + $0x1] ss:$8 sm:$0xf]  ;;  %v51_v3 = vld [vmem:[%s2359_s1] ss:$8 sm:$0xf] }
   0x2   :  { %v54_v1 = vshrl.u32 %v53_v0, 7  ;;  %v1580_v12 = vld [vmem:[%s2359_s1 + $0x2] ss:$8 sm:$0xf]  ;;  %s1669_s17 = smov 113   ;;  %s1670_s20 = smov 127  }
   0x3   :  { %v1581_v25 = vld [vmem:[%s2359_s1 + $0x3] ss:$8 sm:$0xf]  ;;  %v1583_v32 = vld [vmem:[%s2359_s1 + $0x5] ss:$8 sm:$0xf] }
   0x4   :  { %v1728_v4 = vsub.s32 0, %v54_v1  ;;  %v1730_v5 = vsub.s32 1, %v54_v1  ;;  %v1732_v6 = vsub.s32 2, %v54_v1  ;;  %v1734_v7 = vsub.s32 3, %v54_v1  ;;  %s1671_s23 = smov 1   ;;  %s1672_s26 = smov 16  }
   0x5   :  { %v1585_v39 = vld [vmem:[%s2359_s1 + $0x7] ss:$8 sm:$0xf]  ;;  %v1584_v46 = vld [vmem:[%s2359_s1 + $0x6] ss:$8 sm:$0xf] }
   0x6   :  { %v117_v8 = vrot.slane %v1579_v2, %v1728_v4  ;;  %v121_v9 = vrot.slane %v1579_v2, %v1730_v5  ;;  %v56_v10 = vrot.slane %v51_v3, %v1728_v4  ;;  %v60_v11 = vrot.slane %v51_v3, %v1730_v5  ;;  %v1586_v53 = vld [vmem:[%s2359_s1 + $0x20] ss:$8 sm:$0xf]  ;;  %s1673_s27 = smov 15   ;;  %s1674_s28 = smov 17  }
   0x7   :  { %v125_v13 = vrot.slane %v1579_v2, %v1732_v6  ;;  %v129_v14 = vrot.slane %v1579_v2, %v1734_v7  ;;  %v64_v15 = vrot.slane %v51_v3, %v1732_v6  ;;  %v68_v16 = vrot.slane %v51_v3, %v1734_v7 }
   0x8   :  { %v130_v17 = vcombine.low %v117_v8, %v121_v9  ;;  %v69_v18 = vcombine.low %v56_v10, %v60_v11  ;;  %v185_v20 = vrot.slane %v1580_v12, %v1732_v6  ;;  %v189_v21 = vrot.slane %v1580_v12, %v1734_v7  ;;  %v1815_v8 = vld [vmem:[%s2360_s0 + $0x8] sm:$0xff] }
   0x9   :  { %v131_v19 = vcombine.low %v125_v13, %v129_v14  ;;  %v70_v22 = vcombine.low %v64_v15, %v68_v16  ;;  %v177_v23 = vrot.slane %v1580_v12, %v1728_v4  ;;  %v181_v24 = vrot.slane %v1580_v12, %v1730_v5 }
   0xa   :  { %132 = vrot.lane.b32.xlu1 %v130_v17, %s1667_s11  ;;  %71 = vrot.lane.b32.xlu0 %v69_v18, %s1668_s12  ;;  %v191_v26 = vcombine.low %v185_v20, %v189_v21  ;;  %v245_v27 = vrot.slane %v1581_v25, %v1732_v6  ;;  %v249_v28 = vrot.slane %v1581_v25, %v1734_v7  ;;  %vm259_vm3 = vcmask 1039360  }
   0xb   :  { %v190_v29 = vcombine.low %v177_v23, %v181_v24  ;;  %v237_v30 = vrot.slane %v1581_v25, %v1728_v4  ;;  %v241_v31 = vrot.slane %v1581_v25, %v1730_v5  ;;  %v340_v34 = vrot.slane %v1583_v32, %v1732_v6 }
   0xc   :  { %v251_v33 = vcombine.low %v245_v27, %v249_v28  ;;  %v344_v35 = vrot.slane %v1583_v32, %v1734_v7  ;;  %v332_v37 = vrot.slane %v1583_v32, %v1728_v4  ;;  %v336_v38 = vrot.slane %v1583_v32, %v1730_v5  ;;  %v1903_v28 = vld [vmem:[%s2360_s0] sm:$0xff] }
   0xd   :  { %v250_v36 = vcombine.low %v237_v30, %v241_v31  ;;  %v456_v40 = vrot.slane %v1585_v39, %v1732_v6  ;;  %v460_v41 = vrot.slane %v1585_v39, %v1734_v7  ;;  %v448_v42 = vrot.slane %v1585_v39, %v1728_v4 }
   0xe   :  { %134 = vrot.lane.b32.xlu1 %v131_v19, %s1667_s11  ;;  %73 = vrot.lane.b32.xlu0 %v70_v22, %s1668_s12  ;;  %v346_v43 = vcombine.low %v340_v34, %v344_v35  ;;  %v345_v44 = vcombine.low %v332_v37, %v336_v38  ;;  %v452_v45 = vrot.slane %v1585_v39, %v1730_v5  ;;  %vm278_vm4 = vcmask 7168  }
   0xf   :  { %v462_v47 = vcombine.low %v456_v40, %v460_v41  ;;  %v398_v48 = vrot.slane %v1584_v46, %v1732_v6  ;;  %v402_v49 = vrot.slane %v1584_v46, %v1734_v7  ;;  %v390_v51 = vrot.slane %v1584_v46, %v1728_v4  ;;  %v1582_v40 = vld [vmem:[%s2359_s1 + $0x4] ss:$8 sm:$0xf] }
  0x10   :  { %v461_v50 = vcombine.low %v448_v42, %v452_v45  ;;  %v394_v52 = vrot.slane %v1584_v46, %v1730_v5  ;;  %v506_v55 = vrot.slane %v1586_v53, %v1728_v4  ;;  %v510_v56 = vrot.slane %v1586_v53, %v1730_v5 }
  0x11   :  { %v404_v54 = vcombine.low %v398_v48, %v402_v49  ;;  %v514_v58 = vrot.slane %v1586_v53, %v1732_v6  ;;  %v518_v59 = vrot.slane %v1586_v53, %v1734_v7  ;;  %v1675_v25 = vmov 0.0  }
  0x12   :  { %194 = vrot.lane.b32.xlu1 %v191_v26, %s1669_s17  ;;  %192 = vrot.lane.b32.xlu0 %v190_v29, %s1669_s17  ;;  %v403_v57 = vcombine.low %v390_v51, %v394_v52  ;;  %v519_v60 = vcombine.low %v506_v55, %v510_v56  ;;  %31 = vst [vmem:[#allocation2] sm:$0xff] %v1675_v25  ;;  %32 = vst [vmem:[#allocation2 + $0x8] sm:$0xff] %v1675_v25  ;;  %vm77_vm5 = vcmask 1043456   ;;  %vm158_vm6 = vcmask 130048  }
  0x13   :  { %v520_v61 = vcombine.low %v514_v58, %v518_v59  ;;  %33 = vst [vmem:[#allocation2 + $0x10] sm:$0xff] %v1675_v25  ;;  %34 = vst [vmem:[#allocation2 + $0x18] sm:$0xff] %v1675_v25  ;;  %659 = vmatprep.mubr.f32.mxu0 %v1675_v25  ;;  %730 = vmatprep.mubr.f32.mxu1 %v1675_v25  ;;  %vm218_vm7 = vcmask 121856   ;;  %vm98_vm8 = vcmask 138240   ;;  %vm106_vm9 = vcmask 1043592  }
  0x14   :  { %35 = vst [vmem:[#allocation2 + $0x20] sm:$0xff] %v1675_v25  ;;  %36 = vst [vmem:[#allocation2 + $0x28] sm:$0xff] %v1675_v25  ;;  %vm226_vm10 = vcmask 1043576   ;;  %vm382_vm11 = vcmask 1039364   ;;  %vm166_vm12 = vcmask 1047684   ;;  %vm286_vm13 = vcmask 1047564  }
  0x15   :  { %37 = vst [vmem:[#allocation2 + $0x30] sm:$0xff] %v1675_v25  ;;  %38 = vst [vmem:[#allocation2 + $0x38] sm:$0xff] %v1675_v25  ;;  %vm440_vm14 = vcmask 920576   ;;  %vm498_vm15 = vcmask 916484  }
  0x16   :  { %254 = vrot.lane.b32.xlu1 %v251_v33, %s1670_s20  ;;  %252 = vrot.lane.b32.xlu0 %v250_v36, %s1670_s20  ;;  %39 = vst [vmem:[#allocation2 + $0x40] sm:$0xff] %v1675_v25  ;;  %40 = vst [vmem:[#allocation2 + $0x48] sm:$0xff] %v1675_v25 }
  0x17   :  { %41 = vst [vmem:[#allocation2 + $0x50] sm:$0xff] %v1675_v25  ;;  %42 = vst [vmem:[#allocation2 + $0x58] sm:$0xff] %v1675_v25 }
  0x18   :  { %43 = vst [vmem:[#allocation2 + $0x60] sm:$0xff] %v1675_v25  ;;  %44 = vst [vmem:[#allocation2 + $0x68] sm:$0xff] %v1675_v25 }
  0x19   :  { %45 = vst [vmem:[#allocation2 + $0x70] sm:$0xff] %v1675_v25  ;;  %46 = vst [vmem:[#allocation2 + $0x78] sm:$0xff] %v1675_v25 }
  0x1a   :  { %349 = vrot.lane.b32.xlu1 %v346_v43, %s1671_s23  ;;  %347 = vrot.lane.b32.xlu0 %v345_v44, %s1671_s23  ;;  %47 = vst [vmem:[#allocation2 + $0x80] sm:$0xf] %v1675_v25  ;;  %48 = vst [vmem:[#allocation2 + $0x88] sm:$0xf] %v1675_v25  ;;  %v305_v43 = vrot.slane %v1582_v40, %v1732_v6 }
  0x1b   :  { %49 = vst [vmem:[#allocation2 + $0x90] sm:$0xf] %v1675_v25  ;;  %50 = vst [vmem:[#allocation2 + $0x98] sm:$0xf] %v1675_v25 }
  0x1c   :  { %788 = vst [vmem:[#allocation3] sm:$0xff] %v1675_v25  ;;  %792 = vst [vmem:[#allocation3 + $0x20] sm:$0xff] %v1675_v25 }
  0x1d   :  { %796 = vst [vmem:[#allocation3 + $0x40] sm:$0xff] %v1675_v25  ;;  %800 = vst [vmem:[#allocation3 + $0x60] sm:$0xff] %v1675_v25 }
  0x1e   :  { %465 = vrot.lane.b32.xlu1 %v462_v47, %s1672_s26  ;;  %463 = vrot.lane.b32.xlu0 %v461_v50, %s1672_s26  ;;  %811 = vst [vmem:[#allocation3 + $0xb8] sm:$0xff] %v1675_v25  ;;  %815 = vst [vmem:[#allocation3 + $0xd8] sm:$0xff] %v1675_v25  ;;  %v309_v47 = vrot.slane %v1582_v40, %v1734_v7 }
  0x1f   :  { %819 = vst [vmem:[#allocation3 + $0xf8] sm:$0xff] %v1675_v25  ;;  %823 = vst [vmem:[#allocation3 + $0x118] sm:$0xff] %v1675_v25 }
  0x20   :  { %v311_v52 = vcombine.low %v305_v43, %v309_v47 }
  0x22   :  { %407 = vrot.lane.b32.xlu1 %v404_v54, %s1673_s27  ;;  %405 = vrot.lane.b32.xlu0 %v403_v57, %s1673_s27  ;;  %v315_v57 = vmul.f32 %v311_v52, %v1815_v8 }
  0x24   :  { %324 = vst [vmem:[#allocation2 + $0x50] sm:$0xf] %v315_v57 }
  0x26   :  { %521 = vrot.lane.b32.xlu0 %v519_v60, %s1674_s28  ;;  %523 = vrot.lane.b32.xlu1 %v520_v61, %s1674_s28  ;;  %v319_v60 = vcombine.high %v315_v57, %v315_v57  ;;  %v297_v61 = vrot.slane %v1582_v40, %v1728_v4 }
  0x28   :  { %325 = vst [vmem:[#allocation2 + $0x58] sm:$0xf] %v319_v60 }
  0x7c   :  { %v1802_v62 = vpop.permute.xlu1 %132  ;;  %v1804_v63 = vpop.permute.xlu0 %71 }
  0x7d   :  { %v75_v29 = vrot.slane %v1804_v63, 4  ;;  %v136_v34 = vrot.slane %v1802_v62, 4 }
  0x80   :  { %v1806_v0 = vpop.permute.xlu1 %134  ;;  %v1808_v1 = vpop.permute.xlu0 %73 }
  0x81   :  { %v137_v2 = vrot.slane %v1806_v0, 4  ;;  %v76_v3 = vrot.slane %v1808_v1, 4 }
  0x83   :  { %v141_v9 = vsel %vm139_vm1, %v1806_v0, %v137_v2  ;;  %v81_v10 = vsel %vm79_vm0, %v1808_v1, %v76_v3  ;;  %v78_v36 = vsel %vm77_vm5, %v75_v29, %v76_v3  ;;  %v138_v46 = vsel %vm77_vm5, %v136_v34, %v137_v2 }
  0x84   :  { %v1825_v11 = vpop.permute.xlu1 %194  ;;  %v1827_v12 = vpop.permute.xlu0 %192  ;;  %v1830_v13 = vmul.f32 %v81_v10, %v1815_v8  ;;  %v1833_v14 = vmul.f32 %v141_v9, %v1815_v8  ;;  %v80_v42 = vsel %vm79_vm0, %v1804_v63, %v78_v36  ;;  %v140_v54 = vsel %vm139_vm1, %v1802_v62, %v138_v46 }
  0x85   :  { %v197_v15 = vrot.slane %v1825_v11, 4  ;;  %v196_v35 = vrot.slane %v1827_v12, 4  ;;  %v84_v51 = vmul.f32 %v80_v42, %v1903_v28  ;;  %v144_v58 = vmul.f32 %v140_v54, %v1903_v28 }
  0x86   :  { %94 = vrot.lane.b32.xlu0 %v1830_v13, %s1674_s28  ;;  %156 = vrot.lane.b32.xlu1 %v1833_v14, %s1672_s26  ;;  %v301_v63 = vrot.slane %v1582_v40, %v1730_v5  ;;  %v149_v9 = vcombine.low %v1833_v14, %v1833_v14 }
  0x87   :  { %v201_v16 = vsel %vm199_vm2, %v1825_v11, %v197_v15  ;;  %v198_v44 = vsel %vm77_vm5, %v196_v35, %v197_v15  ;;  %v88_v34 = vcombine.high %v84_v51, %v84_v51 }
  0x88   :  { %v1844_v17 = vpop.permute.xlu1 %254  ;;  %v1846_v18 = vpop.permute.xlu0 %252  ;;  %v1849_v19 = vmul.f32 %v201_v16, %v1815_v8  ;;  %v200_v53 = vsel %vm199_vm2, %v1827_v12, %v198_v44  ;;  %v310_v2 = vcombine.low %v297_v61, %v301_v63 }
  0x89   :  { %v257_v20 = vrot.slane %v1844_v17, 4  ;;  %v256_v45 = vrot.slane %v1846_v18, 4  ;;  %v204_v59 = vmul.f32 %v200_v53, %v1903_v28 }
  0x8a   :  { %214 = vrot.lane.b32.xlu0 %v1849_v19, %s1673_s27  ;;  %v314_v11 = vmul.f32 %v310_v2, %v1903_v28 }
  0x8b   :  { %v261_v21 = vsel %vm259_vm3, %v1844_v17, %v257_v20  ;;  %v258_v55 = vsel %vm77_vm5, %v256_v45, %v257_v20  ;;  %v89_v20 = vcombine.high %v1830_v13, %v1830_v13 }
  0x8c   :  { %v1858_v22 = vpop.permute.xlu1 %349  ;;  %v1860_v23 = vpop.permute.xlu0 %347  ;;  %v1863_v24 = vmul.f32 %v261_v21, %v1815_v8  ;;  %v260_v62 = vsel %vm259_vm3, %v1846_v18, %v258_v55  ;;  %322 = vst [vmem:[#allocation2 + $0x40] sm:$0xf] %v314_v11 }
  0x8d   :  { %v351_v26 = vrot.slane %v1860_v23, 4  ;;  %v352_v0 = vrot.slane %v1858_v22, 4  ;;  %v264_v3 = vmul.f32 %v260_v62, %v1903_v28 }
  0x8e   :  { %276 = vrot.lane.b32.xlu1 %v1863_v24, %s1671_s23  ;;  %v269_v16 = vcombine.low %v1863_v24, %v1863_v24  ;;  %v209_v24 = vcombine.high %v1849_v19, %v1849_v19 }
  0x8f   :  { %v353_v27 = vsel %vm278_vm4, %v351_v26, %v1860_v23  ;;  %v354_v12 = vsel %vm77_vm5, %v351_v26, %v352_v0  ;;  %v268_v36 = vcombine.low %v264_v3, %v264_v3 }
  0x90   :  { %v1906_v30 = vpop.permute.xlu0 %463  ;;  %v1909_v31 = vmul.f32 %v353_v27, %v1903_v28  ;;  %v1911_v32 = vpop.permute.xlu1 %465  ;;  %v355_v17 = vsel %vm278_vm4, %v354_v12, %v1858_v22  ;;  %v318_v27 = vcombine.high %v314_v11, %v314_v11 }
  0x91   :  { %v467_v33 = vrot.slane %v1906_v30, 4  ;;  %v359_v14 = vmul.f32 %v355_v17, %v1815_v8  ;;  %v468_v29 = vrot.slane %v1911_v32, 4 }
  0x92   :  { %366 = vrot.lane.b32.xlu0 %v1909_v31, %s1670_s20  ;;  %v362_v21 = vcombine.low %v1909_v31, %v1909_v31  ;;  %323 = vst [vmem:[#allocation2 + $0x48] sm:$0xf] %v318_v27  ;;  %v148_v31 = vcombine.low %v144_v58, %v144_v58 }
  0x93   :  { %v469_v37 = vsel %vm158_vm6, %v467_v33, %v1906_v30  ;;  %v470_v19 = vsel %vm77_vm5, %v467_v33, %v468_v29  ;;  %v363_v30 = vcombine.low %v359_v14, %v359_v14 }
  0x94   :  { %v406_v38 = vpop.permute.xlu0 %405  ;;  %v1926_v39 = vmul.f32 %v469_v37, %v1903_v28  ;;  %v408_v48 = vpop.permute.xlu1 %407  ;;  %v208_v37 = vcombine.high %v204_v59, %v204_v59 }
  0x95   :  { %v409_v41 = vrot.slane %v406_v38, 4  ;;  %v410_v56 = vrot.slane %v408_v48, 4 }
  0x96   :  { %482 = vrot.lane.b32.xlu0 %v1926_v39, %s1667_s11  ;;  %v478_v26 = vcombine.low %v1926_v39, %v1926_v39 }
  0x97   :  { %v411_v49 = vsel %vm218_vm7, %v409_v41, %v406_v38  ;;  %v412_v1 = vsel %vm77_vm5, %v409_v41, %v410_v56  ;;  %v471_v38 = vsel %vm158_vm6, %v470_v19, %v1911_v32 }
  0x98   :  { %v416_v50 = vmul.f32 %v411_v49, %v1903_v28  ;;  %v413_v10 = vsel %vm218_vm7, %v412_v1, %v408_v48  ;;  %v522_v23 = vpop.permute.xlu0 %521  ;;  %v524_v40 = vpop.permute.xlu1 %523  ;;  %v475_v33 = vmul.f32 %v471_v38, %v1815_v8 }
  0x99   :  { %v417_v15 = vmul.f32 %v413_v10, %v1815_v8  ;;  %v525_v22 = vrot.slane %v522_v23, 4  ;;  %v526_v41 = vrot.slane %v524_v40, 4 }
  0x9a   :  { %422 = vrot.lane.b32.xlu1 %v416_v50, %s1669_s17  ;;  %90 = vrot.lane.b32.xlu0 %v84_v51, %s1674_s28  ;;  %v420_v18 = vcombine.high %v416_v50, %v416_v50  ;;  %v479_v42 = vcombine.low %v475_v33, %v475_v33 }
  0x9b   :  { %v527_v13 = vsel %vm98_vm8, %v525_v22, %v522_v23  ;;  %v528_v43 = vsel %vm77_vm5, %v525_v22, %v526_v41 }
  0x9c   :  { %v532_v35 = vmul.f32 %v527_v13, %v1903_v28  ;;  %v421_v28 = vcombine.high %v417_v15, %v417_v15  ;;  %v529_v32 = vsel %vm98_vm8, %v528_v43, %v524_v40 }
  0x9d   :  { %v533_v44 = vmul.f32 %v529_v32, %v1815_v8 }
  0x9e   :  { %152 = vrot.lane.b32.xlu1 %v144_v58, %s1672_s26  ;;  %210 = vrot.lane.b32.xlu0 %v204_v59, %s1673_s27  ;;  %v536_v39 = vcombine.high %v532_v35, %v532_v35 }
  0x9f   :  { %v537_v45 = vcombine.high %v533_v44, %v533_v44 }
  0xa2   :  { %272 = vrot.lane.b32.xlu1 %v264_v3, %s1671_s23  ;;  %154 = vrot.lane.b32.xlu0 %v149_v9, %s1672_s26 }
  0xa6   :  { %426 = vrot.lane.b32.xlu1 %v417_v15, %s1669_s17  ;;  %274 = vrot.lane.b32.xlu0 %v269_v16, %s1671_s23 }
  0xaa   :  { %370 = vrot.lane.b32.xlu1 %v359_v14, %s1670_s20  ;;  %424 = vrot.lane.b32.xlu0 %v420_v18, %s1669_s17 }
  0xae   :  { %96 = vrot.lane.b32.xlu1 %v89_v20, %s1674_s28  ;;  %364 = vrot.lane.b32.xlu0 %v362_v21, %s1670_s20 }
  0xb2   :  { %216 = vrot.lane.b32.xlu1 %v209_v24, %s1673_s27  ;;  %480 = vrot.lane.b32.xlu0 %v478_v26, %s1667_s11 }
  0xb6   :  { %150 = vrot.lane.b32.xlu0 %v148_v31, %s1672_s26  ;;  %92 = vrot.lane.b32.xlu1 %v88_v34, %s1674_s28 }
  0xba   :  { %270 = vrot.lane.b32.xlu0 %v268_v36, %s1671_s23  ;;  %212 = vrot.lane.b32.xlu1 %v208_v37, %s1673_s27 }
  0xbe   :  { %540 = vrot.lane.b32.xlu0 %v536_v39, %s1668_s12  ;;  %368 = vrot.lane.b32.xlu1 %v363_v30, %s1670_s20 }
  0xc2   :  { %428 = vrot.lane.b32.xlu0 %v421_v28, %s1669_s17  ;;  %484 = vrot.lane.b32.xlu1 %v479_v42, %s1667_s11 }
  0xc6   :  { %538 = vrot.lane.b32.xlu0 %v532_v35, %s1668_s12  ;;  %486 = vrot.lane.b32.xlu1 %v475_v33, %s1667_s11 }
  0xca   :  { %542 = vrot.lane.b32.xlu1 %v533_v44, %s1668_s12 }
  0xce   :  { %544 = vrot.lane.b32.xlu1 %v537_v45, %s1668_s12 }
  0xf8   :  { %v95_v46 = vpop.permute.xlu0 %94  ;;  %v157_v48 = vpop.permute.xlu1 %156 }
  0xfc   :  { %v215_v47 = vpop.permute.xlu0 %214 }
 0x100   :  { %v277_v50 = vpop.permute.xlu1 %276 }
 0x104   :  { %v2021_v49 = vpop.permute.xlu0 %366 }
 0x108   :  { %v2023_v51 = vpop.permute.xlu0 %482 }
 0x10c   :  { %v423_v52 = vpop.permute.xlu1 %422  ;;  %v91_v53 = vpop.permute.xlu0 %90 }
 0x10d   :  { %107 = vst.msk [vmem:[#allocation2] sm:$0xf] %vm106_vm9, %v91_v53  ;;  %vm556_vm9 = vcmask 904192  }
 0x110   :  { %v153_v54 = vpop.permute.xlu1 %152  ;;  %v211_v8 = vpop.permute.xlu0 %210 }
 0x111   :  { %227 = vst.msk [vmem:[#allocation2 + $0x20] sm:$0xf] %vm226_vm10, %v211_v8  ;;  %vm579_vm10 = vcmask 293888  }
 0x114   :  { %v273_v55 = vpop.permute.xlu1 %272  ;;  %v155_v56 = vpop.permute.xlu0 %154 }
 0x115   :  { %v160_v57 = vsel %vm158_vm6, %v153_v54, %v155_v56  ;;  %v161_v58 = vsel %vm158_vm6, %v155_v56, %v157_v48 }
 0x116   :  { %169 = vst [vmem:[#allocation2 + $0x10] sm:$0xf0] %v160_v57  ;;  %170 = vst [vmem:[#allocation2 + $0x18] sm:$0xf0] %v161_v58 }
 0x118   :  { %v427_v59 = vpop.permute.xlu1 %426  ;;  %v275_v60 = vpop.permute.xlu0 %274 }
 0x119   :  { %v280_v61 = vsel %vm278_vm4, %v273_v55, %v275_v60  ;;  %v281_v62 = vsel %vm278_vm4, %v275_v60, %v277_v50 }
 0x11a   :  { %289 = vst [vmem:[#allocation2 + $0x30] sm:$0xf0] %v280_v61  ;;  %290 = vst [vmem:[#allocation2 + $0x38] sm:$0xf0] %v281_v62 }
 0x11c   :  { %v371_v63 = vpop.permute.xlu1 %370  ;;  %v425_v0 = vpop.permute.xlu0 %424 }
 0x11d   :  { %383 = vst.msk [vmem:[#allocation2 + $0x58] sm:$0xf0] %vm382_vm11, %v371_v63  ;;  %v430_v1 = vsel %vm199_vm2, %v423_v52, %v425_v0  ;;  %v431_v2 = vsel %vm199_vm2, %v425_v0, %v427_v59  ;;  %vm941_vm11 = vcmask 1047680  }
 0x11e   :  { %437 = vst [vmem:[#allocation2 + $0x60] sm:$0xf] %v430_v1  ;;  %438 = vst [vmem:[#allocation2 + $0x68] sm:$0xf] %v431_v2 }
 0x120   :  { %v97_v3 = vpop.permute.xlu1 %96  ;;  %v365_v9 = vpop.permute.xlu0 %364 }
 0x121   :  { %v101_v10 = vsel %vm98_vm8, %v95_v46, %v97_v3  ;;  %v372_v11 = vsel %vm259_vm3, %v365_v9, %v2021_v49  ;;  %v558_v3 = vld [vmem:[%s2361_s2] sm:$0xff] }
 0x122   :  { %110 = vst [vmem:[#allocation2 + $0x18] sm:$0xf] %v101_v10  ;;  %379 = vst [vmem:[#allocation2 + $0x40] sm:$0xf0] %v372_v11 }
 0x124   :  { %v217_v12 = vpop.permute.xlu1 %216  ;;  %v481_v15 = vpop.permute.xlu0 %480 }
 0x125   :  { %v221_v16 = vsel %vm218_vm7, %v215_v47, %v217_v12  ;;  %v488_v17 = vsel %vm139_vm1, %v481_v15, %v2023_v51  ;;  %v1676_v12 = vmov 0   ;;  %v774_v15 = vld [vmem:[%s2362_s4] sm:$0xff] }
 0x126   :  { %230 = vst [vmem:[#allocation2 + $0x38] sm:$0xf] %v221_v16  ;;  %495 = vst [vmem:[#allocation2 + $0x60] sm:$0xf0] %v488_v17  ;;  %1662 = vset.pattern.permute.xlu1 %v1676_v12  ;;  %1661 = vset.pattern.permute.xlu0 %v1676_v12 }
 0x127   :  { %777 = vperm.xlu1 %1662, %v774_v15   ;;  %v824_v16 = vld [vmem:[%s2359_s1] ss:$8 sm:$0xf] }
 0x128   :  { %v151_v14 = vpop.permute.xlu0 %150  ;;  %v93_v18 = vpop.permute.xlu1 %92  ;;  %v829_v17 = vrot.slane %v824_v16, %v1728_v4 }
 0x129   :  { %v159_v20 = vsel %vm158_vm6, %v151_v14, %v153_v54  ;;  %167 = vst.msk [vmem:[#allocation2] sm:$0xf0] %vm166_vm12, %v151_v14  ;;  %v99_v21 = vsel %vm98_vm8, %v91_v53, %v93_v18  ;;  %v100_v23 = vsel %vm98_vm8, %v93_v18, %v95_v46  ;;  %v562_v13 = vld [vmem:[#allocation2 + $0x18] sm:$0xff]  ;;  %v567_v56 = vld [vmem:[#allocation2 + $0x40] sm:$0xff]  ;;  %v833_v14 = vrot.slane %v824_v16, %v1730_v5 }
 0x12a   :  { %168 = vst [vmem:[#allocation2 + $0x8] sm:$0xf0] %v159_v20  ;;  %108 = vst [vmem:[#allocation2 + $0x8] sm:$0xf] %v99_v21  ;;  %vm1002_vm12 = vcmask 1047672  }
 0x12b   :  { %109 = vst [vmem:[#allocation2 + $0x10] sm:$0xf] %v100_v23  ;;  %842 = vrot.lane.b32.xlu1 %v829_v17, %s1668_s12  ;;  %v1593_v18 = vld [vmem:[%s2359_s1 + $0x1] ss:$8 sm:$0xf] }
 0x12c   :  { %v271_v22 = vpop.permute.xlu0 %270  ;;  %v213_v24 = vpop.permute.xlu1 %212  ;;  %v890_v20 = vrot.slane %v1593_v18, %v1728_v4  ;;  %v894_v21 = vrot.slane %v1593_v18, %v1730_v5  ;;  %v898_v23 = vrot.slane %v1593_v18, %v1732_v6 }
 0x12d   :  { %v279_v26 = vsel %vm278_vm4, %v271_v22, %v273_v55  ;;  %287 = vst.msk [vmem:[#allocation2 + $0x20] sm:$0xf0] %vm286_vm13, %v271_v22  ;;  %v219_v27 = vsel %vm218_vm7, %v211_v8, %v213_v24  ;;  %v220_v29 = vsel %vm218_vm7, %v213_v24, %v215_v47  ;;  %v566_v31 = vld [vmem:[#allocation2 + $0x38] sm:$0xff]  ;;  %v571_v52 = vld [vmem:[#allocation2 + $0x60] sm:$0xff]  ;;  %v902_v22 = vrot.slane %v1593_v18, %v1734_v7 }
 0x12e   :  { %288 = vst [vmem:[#allocation2 + $0x28] sm:$0xf0] %v279_v26  ;;  %228 = vst [vmem:[#allocation2 + $0x28] sm:$0xf] %v219_v27  ;;  %v1611_v34 = vpack.c.bf16 %v566_v31, %v562_v13  ;;  %v1609_v57 = vpack.c.bf16 %v571_v52, %v567_v56 }
 0x12f   :  { %229 = vst [vmem:[#allocation2 + $0x30] sm:$0xf] %v220_v29  ;;  %844 = vrot.lane.b32.xlu1 %v833_v14, %s1668_s12  ;;  %v1594_v24 = vld [vmem:[%s2359_s1 + $0x2] ss:$8 sm:$0xf] }
 0x130   :  { %1612 = vmatprep.subr.bf16.mxu1 %v1611_v34  ;;  %v541_v19 = vpop.permute.xlu0 %540  ;;  %v369_v35 = vpop.permute.xlu1 %368  ;;  %v559_v45 = vld [vmem:[#allocation2] sm:$0xff]  ;;  %v955_v26 = vrot.slane %v1594_v24, %v1730_v5 }
 0x131   :  { %v373_v36 = vsel %vm259_vm3, %v2021_v49, %v369_v35  ;;  %v374_v37 = vsel %vm259_vm3, %v369_v35, %v371_v63  ;;  %v560_v40 = vld [vmem:[#allocation2 + $0x8] sm:$0xff] }
 0x132   :  { %380 = vst [vmem:[#allocation2 + $0x48] sm:$0xf0] %v373_v36  ;;  %381 = vst [vmem:[#allocation2 + $0x50] sm:$0xf0] %v374_v37  ;;  %v561_v42 = vld [vmem:[#allocation2 + $0x10] sm:$0xff] }
 0x133   :  { %v1595_v27 = vld [vmem:[%s2359_s1 + $0x3] ss:$8 sm:$0xf]  ;;  %v1597_v34 = vld [vmem:[%s2359_s1 + $0x5] ss:$8 sm:$0xf] }
 0x134   :  { %v429_v38 = vpop.permute.xlu0 %428  ;;  %v485_v39 = vpop.permute.xlu1 %484  ;;  %v563_v30 = vld [vmem:[#allocation2 + $0x20] sm:$0xff]  ;;  %v1012_v29 = vrot.slane %v1595_v27, %v1728_v4  ;;  %v1020_v13 = vrot.slane %v1595_v27, %v1732_v6  ;;  %v1024_v31 = vrot.slane %v1595_v27, %v1734_v7  ;;  %v1115_v35 = vrot.slane %v1597_v34, %v1734_v7 }
 0x135   :  { %v432_v33 = vsel %vm199_vm2, %v427_v59, %v429_v38  ;;  %441 = vst.msk [vmem:[#allocation2 + $0x78] sm:$0xf] %vm440_vm14, %v429_v38  ;;  %v489_v41 = vsel %vm139_vm1, %v2023_v51, %v485_v39  ;;  %v564_v28 = vld [vmem:[#allocation2 + $0x28] sm:$0xff]  ;;  %v1605_v46 = vpack.c.bf16 %v563_v30, %v559_v45  ;;  %v570_v59 = vld [vmem:[#allocation2 + $0x58] sm:$0xff]  ;;  %v1016_v45 = vrot.slane %v1595_v27, %v1730_v5 }
 0x136   :  { %v565_v43 = vld [vmem:[#allocation2 + $0x30] sm:$0xff]  ;;  %439 = vst [vmem:[#allocation2 + $0x70] sm:$0xf] %v432_v33  ;;  %496 = vst [vmem:[#allocation2 + $0x68] sm:$0xf0] %v489_v41  ;;  %v1603_v32 = vpack.c.bf16 %v564_v28, %v560_v40  ;;  %v764_v41 = vld [vmem:[%s2363_s3] sm:$0xff]  ;;  %v841_v28 = vrot.slane %v824_v16, %v1734_v7 }
 0x137   :  { %v1613_v44 = vpack.c.bf16 %v565_v43, %v561_v42  ;;  %v951_v42 = vrot.slane %v1594_v24, %v1728_v4  ;;  %v1600_v56 = vld [vmem:[%s2359_s1 + $0x20] ss:$8 sm:$0xf] }
 0x138   :  { %v539_v47 = vpop.permute.xlu0 %538  ;;  %1604 = vmatprep.subr.bf16.mxu0 %v1603_v32  ;;  %v487_v48 = vpop.permute.xlu1 %486  ;;  %v959_v32 = vrot.slane %v1594_v24, %v1732_v6  ;;  %v1295_v18 = vrot.slane %v1600_v56, %v1734_v7 }
 0x139   :  { %1614 = vmatpush1.bf16.msra.mxu1 %v1613_v44  ;;  %v546_v49 = vsel %vm79_vm0, %v539_v47, %v541_v19  ;;  %v490_v50 = vsel %vm139_vm1, %v485_v39, %v487_v48  ;;  %499 = vst.msk [vmem:[#allocation2 + $0x78] sm:$0xf0] %vm498_vm15, %v487_v48  ;;  %1606 = vmatpush1.bf16.msra.mxu0 %v1605_v46  ;;  %v568_v54 = vld [vmem:[#allocation2 + $0x48] sm:$0xff]  ;;  %v569_v63 = vld [vmem:[#allocation2 + $0x50] sm:$0xff] }
 0x13a   :  { %553 = vst [vmem:[#allocation2 + $0x80] sm:$0xf] %v546_v49  ;;  %497 = vst [vmem:[#allocation2 + $0x70] sm:$0xf0] %v490_v50  ;;  %v963_v48 = vrot.slane %v1594_v24, %v1734_v7  ;;  %v1103_v49 = vrot.slane %v1597_v34, %v1728_v4  ;;  %v1111_v50 = vrot.slane %v1597_v34, %v1732_v6 }
 0x13c   :  { %v543_v51 = vpop.permute.xlu1 %542 }
 0x13d   :  { %v547_v53 = vsel %vm79_vm0, %v541_v19, %v543_v51  ;;  %v572_v8 = vld [vmem:[#allocation2 + $0x68] sm:$0xff]  ;;  %v1107_v19 = vrot.slane %v1597_v34, %v1730_v5 }
 0x13e   :  { %554 = vst [vmem:[#allocation2 + $0x88] sm:$0xf] %v547_v53  ;;  %v1607_v55 = vpack.c.bf16 %v572_v8, %v568_v54  ;;  %v1599_v54 = vld [vmem:[%s2359_s1 + $0x7] ss:$8 sm:$0xf] }
 0x13f   :  { %v1227_v8 = vrot.slane %v1599_v54, %v1730_v5  ;;  %v1231_v17 = vrot.slane %v1599_v54, %v1732_v6  ;;  %v1235_v14 = vrot.slane %v1599_v54, %v1734_v7 }
 0x140   :  { %1608 = vmatprep.subr.bf16.mxu0 %v1607_v55  ;;  %v545_v58 = vpop.permute.xlu1 %544  ;;  %v574_v60 = vld [vmem:[#allocation2 + $0x78] sm:$0xff] }
 0x141   :  { %v548_v61 = vsel %vm79_vm0, %v543_v51, %v545_v58  ;;  %557 = vst.msk [vmem:[#allocation2 + $0x98] sm:$0xf] %vm556_vm9, %v545_v58  ;;  %1610 = vmatpush1.bf16.msra.mxu0 %v1609_v57  ;;  %v1615_v62 = vpack.c.bf16 %v574_v60, %v570_v59  ;;  %v573_v0 = vld [vmem:[#allocation2 + $0x70] sm:$0xff]  ;;  %v575_v9 = vld [vmem:[#allocation2 + $0x80] sm:$0xf]  ;;  %v1283_v57 = vrot.slane %v1600_v56, %v1728_v4 }
 0x142   :  { %555 = vst [vmem:[#allocation2 + $0x90] sm:$0xf] %v548_v61  ;;  %v1617_v1 = vpack.c.bf16 %v573_v0, %v569_v63  ;;  %v1598_v51 = vld [vmem:[%s2359_s1 + $0x6] ss:$8 sm:$0xf]  ;;  %v1291_v58 = vrot.slane %v1600_v56, %v1732_v6 }
 0x143   :  { %1616 = vmatprep.subr.bf16.mxu1 %v1615_v62  ;;  %v1163_v52 = vrot.slane %v1598_v51, %v1728_v4  ;;  %v1171_v53 = vrot.slane %v1598_v51, %v1732_v6  ;;  %v1175_v55 = vrot.slane %v1598_v51, %v1734_v7  ;;  %v1167_v15 = vrot.slane %v1598_v51, %v1730_v5 }
 0x144   :  { %1618 = vmatpush1.bf16.msra.mxu1 %v1617_v1 }
 0x145   :  { %v576_v2 = vld [vmem:[#allocation2 + $0x88] sm:$0xf] }
 0x146   :  { %1587 = vmatprep.subr.msk.mxu0 %vm77_vm5, %v576_v2 }
 0x147   :  { %1588 = vmatpush1.msk.msra.mxu0 %vm77_vm5, %v575_v9 }
 0x148   :  { %1589 = vmatmul.mubr.msk.f32.vlgmr.msra.gmra.mrb[0].mxu0 %vm579_vm10, %v558_v3  ;;  %v578_v10 = vld [vmem:[#allocation2 + $0x98] sm:$0xf] }
 0x149   :  { %1590 = vmatprep.subr.msk.mxu1 %vm77_vm5, %v578_v10  ;;  %v577_v11 = vld [vmem:[#allocation2 + $0x90] sm:$0xf]  ;;  %1443 = vmatprep.mubr.f32.mxu0 %v1675_v25 }
 0x14a   :  { %1591 = vmatpush1.msk.msra.mxu1 %vm77_vm5, %v577_v11  ;;  %vm880_vm5 = vcmask 1047688  }
 0x14b   :  { %1592 = vmatmul.mubr.msk.f32.vlgmr.msra.gmra.mrb[0].mxu1 %vm579_vm10, %v558_v3 }
 0x14c   :  { %1514 = vmatprep.mubr.f32.mxu1 %v1675_v25  ;;  %v837_v25 = vrot.slane %v824_v16, %v1732_v6  ;;  %v1223_v16 = vrot.slane %v1599_v54, %v1728_v4 }
 0x14e   :  { %846 = vrot.lane.b32.xlu1 %v837_v25, %s1668_s12  ;;  %v1287_v25 = vrot.slane %v1600_v56, %v1730_v5 }
 0x152   :  { %903 = vrot.lane.b32.xlu1 %v890_v20, %s1667_s11 }
 0x156   :  { %905 = vrot.lane.b32.xlu1 %v894_v21, %s1667_s11 }
 0x15a   :  { %907 = vrot.lane.b32.xlu1 %v898_v23, %s1667_s11 }
 0x15e   :  { %909 = vrot.lane.b32.xlu1 %v902_v22, %s1667_s11 }
 0x162   :  { %966 = vrot.lane.b32.xlu1 %v955_v26, %s1669_s17 }
 0x166   :  { %1025 = vrot.lane.b32.xlu1 %v1012_v29, %s1670_s20 }
 0x16a   :  { %1029 = vrot.lane.b32.xlu1 %v1020_v13, %s1670_s20 }
 0x16e   :  { %1031 = vrot.lane.b32.xlu1 %v1024_v31, %s1670_s20 }
 0x172   :  { %1118 = vrot.lane.b32.xlu1 %v1107_v19, %s1671_s23 }
 0x176   :  { %1122 = vrot.lane.b32.xlu1 %v1115_v35, %s1671_s23 }
 0x1a6   :  { %v2112_v43 = vpop.permute.xlu1 %777 }
 0x1aa   :  { %v843_v44 = vpop.permute.xlu1 %842 }
 0x1ae   :  { %v2118_v46 = vpop.permute.xlu1 %844 }
 0x1af   :  { %v2122_v47 = vsel %vm79_vm0, %v843_v44, %v2118_v46 }
 0x1c0   :  { %v847_v20 = vpop.permute.xlu1 %846 }
 0x1c1   :  { %v851_v56 = vsel %vm79_vm0, %v2118_v46, %v847_v20 }
 0x1c4   :  { %v904_v21 = vpop.permute.xlu1 %903 }
 0x1c8   :  { %v906_v23 = vpop.permute.xlu1 %905 }
 0x1cc   :  { %v908_v22 = vpop.permute.xlu1 %907 }
 0x1d0   :  { %v910_v24 = vpop.permute.xlu1 %909 }
 0x1d4   :  { %v2164_v26 = vpop.permute.xlu1 %966 }
 0x1d8   :  { %v2166_v27 = vpop.permute.xlu1 %1025 }
 0x1dc   :  { %v2168_v29 = vpop.permute.xlu1 %1029 }
 0x1e0   :  { %v2170_v13 = vpop.permute.xlu1 %1031 }
 0x1e4   :  { %v2172_v31 = vpop.permute.xlu1 %1118 }
 0x1e8   :  { %v2174_v34 = vpop.permute.xlu1 %1122 }
 0x21b   :  { %v661_v36 = vpop.f32.mrb[0].mxu0 }
 0x21c   :  { %v663_v37 = vpop.f32.mrb[1].mxu0 }
 0x21d   :  { %v737_v38 = vadd.f32 %v663_v37, %v661_v36 }
 0x21e   :  { %v732_v39 = vpop.f32.mrb[0].mxu1 }
 0x21f   :  { %v738_v40 = vadd.f32 %v737_v38, %v732_v39  ;;  %v734_v30 = vpop.f32.mrb[1].mxu1 }
 0x221   :  { %v739_v33 = vadd.f32 %v738_v40, %v734_v30 }
 0x223   :  { %740 = vadd.xlane.f32.xlu0 %v739_v33 }
 0x239   :  { %767 = vperm.xlu0 %1661, %v764_v41  }
 0x23d   :  { %848 = vrot.lane.b32.xlu0 %v841_v28, %s1668_s12 }
 0x241   :  { %964 = vrot.lane.b32.xlu0 %v951_v42, %s1669_s17 }
 0x245   :  { %968 = vrot.lane.b32.xlu0 %v959_v32, %s1669_s17 }
 0x249   :  { %1027 = vrot.lane.b32.xlu0 %v1016_v45, %s1670_s20 }
 0x24d   :  { %970 = vrot.lane.b32.xlu0 %v963_v48, %s1669_s17 }
 0x251   :  { %1116 = vrot.lane.b32.xlu0 %v1103_v49, %s1671_s23 }
 0x255   :  { %1120 = vrot.lane.b32.xlu0 %v1111_v50, %s1671_s23 }
 0x259   :  { %1176 = vrot.lane.b32.xlu0 %v1163_v52, %s1673_s27 }
 0x25d   :  { %1180 = vrot.lane.b32.xlu0 %v1171_v53, %s1673_s27 }
 0x261   :  { %1238 = vrot.lane.b32.xlu0 %v1227_v8, %s1672_s26 }
 0x265   :  { %1182 = vrot.lane.b32.xlu0 %v1175_v55, %s1673_s27  ;;  %v1596_v55 = vld [vmem:[%s2359_s1 + $0x4] ss:$8 sm:$0xf] }
 0x266   :  { %v1081_v46 = vrot.slane %v1596_v55, %v1732_v6 }
 0x269   :  { %1296 = vrot.lane.b32.xlu0 %v1283_v57, %s1674_s28 }
 0x26d   :  { %1300 = vrot.lane.b32.xlu0 %v1291_v58, %s1674_s28 }
 0x2b0   :  { %v741_v59 = vpop.xlane.xlu0 %740 }
 0x2b1   :  { %v743_v60 = vmul.f32 0.001953125, %v741_v59 }
 0x2b3   :  { %v744_v61 = vsub.f32 %v661_v36, %v743_v60  ;;  %v745_v62 = vsub.f32 %v663_v37, %v743_v60  ;;  %v746_v63 = vsub.f32 %v732_v39, %v743_v60  ;;  %v747_v0 = vsub.f32 %v734_v30, %v743_v60 }
 0x2b4   :  { %v1077_v60 = vrot.slane %v1596_v55, %v1730_v5 }
 0x2b5   :  { %v748_v1 = vmul.f32 %v744_v61, %v744_v61  ;;  %v749_v2 = vmul.f32 %v745_v62, %v745_v62  ;;  %v750_v3 = vmul.f32 %v746_v63, %v746_v63  ;;  %v751_v10 = vmul.f32 %v747_v0, %v747_v0 }
 0x2b7   :  { %v752_v9 = vadd.f32 %v749_v2, %v748_v1 }
 0x2b8   :  { %v768_v36 = vpop.permute.xlu0 %767 }
 0x2b9   :  { %v753_v11 = vadd.f32 %v752_v9, %v750_v3 }
 0x2bb   :  { %v754_v12 = vadd.f32 %v753_v11, %v751_v10 }
 0x2bc   :  { %v849_v38 = vpop.permute.xlu0 %848 }
 0x2bd   :  { %755 = vadd.xlane.f32.xlu1 %v754_v12  ;;  %v852_v3 = vsel %vm79_vm0, %v847_v20, %v849_v38  ;;  %v913_v12 = vsel %vm139_vm1, %v908_v22, %v910_v24 }
 0x2c0   :  { %v965_v39 = vpop.permute.xlu0 %964 }
 0x2c4   :  { %v969_v44 = vpop.permute.xlu0 %968 }
 0x2c8   :  { %v1028_v54 = vpop.permute.xlu0 %1027 }
 0x2ce   :  { %1178 = vrot.lane.b32.xlu1 %v1167_v15, %s1673_s27 }
 0x2d2   :  { %1236 = vrot.lane.b32.xlu1 %v1223_v16, %s1672_s26 }
 0x2d6   :  { %1240 = vrot.lane.b32.xlu1 %v1231_v17, %s1672_s26  ;;  %v972_v17 = vsel %vm199_vm2, %v965_v39, %v2164_v26 }
 0x2da   :  { %1242 = vrot.lane.b32.xlu1 %v1235_v14, %s1672_s26  ;;  %v973_v14 = vsel %vm199_vm2, %v2164_v26, %v969_v44 }
 0x2de   :  { %1298 = vrot.lane.b32.xlu1 %v1287_v25, %s1674_s28 }
 0x2e2   :  { %1302 = vrot.lane.b32.xlu1 %v1295_v18, %s1674_s28 }
 0x34a   :  { %v756_v19 = vpop.xlane.xlu1 %755 }
 0x34b   :  { %v757_v35 = vmul.f32 0.001953125, %v756_v19 }
 0x34d   :  { %v758_v37 = vadd.f32 1e-05, %v757_v35 }
 0x34e   :  { %v1179_v35 = vpop.permute.xlu1 %1178 }
 0x34f   :  { %1663 = vrsqrt.f32 %v758_v37 }
 0x359   :  { %v1664_v40 = vpop.eup %1663 }
 0x35a   :  { %v760_v30 = vmul.f32 %v1664_v40, %v744_v61  ;;  %v761_v33 = vmul.f32 %v1664_v40, %v745_v62  ;;  %v763_v41 = vmul.f32 %v1664_v40, %v747_v0  ;;  %v762_v28 = vmul.f32 %v1664_v40, %v746_v63  ;;  %v971_v0 = vpop.permute.xlu0 %970 }
 0x35b   :  { %v1085_v61 = vrot.slane %v1596_v55, %v1734_v7  ;;  %v911_v63 = vsel %vm139_vm1, %v904_v21, %v906_v23  ;;  %v1033_v21 = vsel %vm259_vm3, %v2166_v27, %v1028_v54  ;;  %v974_v19 = vsel %vm199_vm2, %v969_v44, %v971_v0 }
 0x35c   :  { %v770_v42 = vmul.f32 %v768_v36, %v760_v30  ;;  %v771_v32 = vmul.f32 %v768_v36, %v761_v33  ;;  %v773_v49 = vmul.f32 %v768_v36, %v763_v41  ;;  %v772_v50 = vmul.f32 %v768_v36, %v762_v28  ;;  %v1237_v30 = vpop.permute.xlu1 %1236 }
 0x35e   :  { %v780_v45 = vadd.f32 %v2112_v43, %v770_v42  ;;  %v781_v48 = vadd.f32 %v2112_v43, %v771_v32  ;;  %v783_v53 = vadd.f32 %v2112_v43, %v773_v49  ;;  %v782_v8 = vadd.f32 %v2112_v43, %v772_v50  ;;  %v1117_v11 = vpop.permute.xlu0 %1116 }
 0x35f   :  { %v1073_v43 = vrot.slane %v1596_v55, %v1728_v4  ;;  %v1124_v33 = vsel %vm278_vm4, %v1117_v11, %v2172_v31 }
 0x360   :  { %v2178_v51 = vmax.f32 %v780_v45, 0.0  ;;  %v2180_v52 = vmax.f32 %v781_v48, 0.0  ;;  %v2192_v59 = vmax.f32 %v783_v53, 0.0  ;;  %v2196_v62 = vmax.f32 %v782_v8, 0.0  ;;  %v1241_v32 = vpop.permute.xlu1 %1240 }
 0x362   :  { %v858_v57 = vmul.f32 %v851_v56, %v2180_v52  ;;  %v857_v58 = vmul.f32 %v2122_v47, %v2178_v51  ;;  %v912_v47 = vsel %vm139_vm1, %v906_v23, %v908_v22  ;;  %v918_v5 = vmul.f32 %v911_v63, %v2178_v51  ;;  %v1121_v25 = vpop.permute.xlu0 %1120 }
 0x363   :  { %v919_v1 = vmul.f32 %v912_v47, %v2180_v52  ;;  %v2207_v7 = vmul.f32 %v1077_v60, %v2180_v52  ;;  %v2210_v2 = vmul.f32 %v1085_v61, %v2192_v59  ;;  %v2215_v4 = vmul.f32 %v1073_v43, %v2178_v51 }
 0x364   :  { %867 = vrot.lane.b32.xlu1 %v858_v57, %s1674_s28  ;;  %865 = vrot.lane.b32.xlu0 %v857_v58, %s1674_s28  ;;  %v2218_v6 = vmul.f32 %v1081_v46, %v2196_v62  ;;  %v860_v9 = vmul.f32 %v849_v38, %v2192_v59  ;;  %v859_v10 = vmul.f32 %v852_v3, %v2196_v62  ;;  %v1243_v8 = vpop.permute.xlu1 %1242 }
 0x365   :  { %v921_v15 = vmul.f32 %v910_v24, %v2192_v59  ;;  %v920_v16 = vmul.f32 %v913_v12, %v2196_v62  ;;  %v980_v18 = vmul.f32 %v973_v14, %v2180_v52  ;;  %v979_v20 = vmul.f32 %v972_v17, %v2178_v51 }
 0x366   :  { %v1034_v23 = vsel %vm259_vm3, %v1028_v54, %v2168_v29  ;;  %v1177_v22 = vpop.permute.xlu0 %1176  ;;  %v1040_v26 = vmul.f32 %v1033_v21, %v2178_v51  ;;  %v982_v36 = vmul.f32 %v971_v0, %v2192_v59  ;;  %v981_v37 = vmul.f32 %v974_v19, %v2196_v62 }
 0x367   :  { %v1041_v24 = vmul.f32 %v1034_v23, %v2180_v52  ;;  %v1035_v38 = vsel %vm259_vm3, %v2168_v29, %v2170_v13  ;;  %v1043_v39 = vmul.f32 %v2170_v13, %v2192_v59  ;;  %v1125_v41 = vsel %vm278_vm4, %v2172_v31, %v1121_v25 }
 0x368   :  { %928 = vrot.lane.b32.xlu1 %v919_v1, %s1672_s26  ;;  %926 = vrot.lane.b32.xlu0 %v918_v5, %s1672_s26  ;;  %v1042_v40 = vmul.f32 %v1035_v38, %v2196_v62  ;;  %v1133_v42 = vmul.f32 %v1125_v41, %v2196_v62  ;;  %v1132_v29 = vmul.f32 %v1124_v33, %v2180_v52  ;;  %v1299_v61 = vpop.permute.xlu1 %1298 }
 0x369   :  { %v1126_v13 = vsel %vm278_vm4, %v1121_v25, %v2174_v34  ;;  %v1131_v45 = vmul.f32 %v1117_v11, %v2178_v51  ;;  %v1184_v48 = vsel %vm218_vm7, %v1177_v22, %v1179_v35  ;;  %v1191_v58 = vmul.f32 %v1177_v22, %v2178_v51 }
 0x36a   :  { %v1181_v27 = vpop.permute.xlu0 %1180  ;;  %v1134_v44 = vmul.f32 %v1126_v13, %v2192_v59  ;;  %v1192_v50 = vmul.f32 %v1184_v48, %v2180_v52  ;;  %v1251_v60 = vmul.f32 %v1237_v30, %v2178_v51  ;;  %v1246_v46 = vsel %vm158_vm6, %v1241_v32, %v1243_v8 }
 0x36b   :  { %v1185_v31 = vsel %vm218_vm7, %v1179_v35, %v1181_v27  ;;  %v1254_v0 = vmul.f32 %v1246_v46, %v2192_v59 }
 0x36c   :  { %871 = vrot.lane.b32.xlu1 %v860_v9, %s1674_s28  ;;  %869 = vrot.lane.b32.xlu0 %v859_v10, %s1674_s28  ;;  %v1193_v53 = vmul.f32 %v1185_v31, %v2196_v62  ;;  %v1303_v3 = vpop.permute.xlu1 %1302 }
 0x36e   :  { %v1239_v28 = vpop.permute.xlu0 %1238 }
 0x36f   :  { %v1244_v34 = vsel %vm158_vm6, %v1237_v30, %v1239_v28  ;;  %v1245_v54 = vsel %vm158_vm6, %v1239_v28, %v1241_v32 }
 0x370   :  { %932 = vrot.lane.b32.xlu1 %v921_v15, %s1672_s26  ;;  %930 = vrot.lane.b32.xlu0 %v920_v16, %s1672_s26  ;;  %v1252_v55 = vmul.f32 %v1244_v34, %v2180_v52  ;;  %v1253_v56 = vmul.f32 %v1245_v54, %v2196_v62 }
 0x372   :  { %v1183_v49 = vpop.permute.xlu0 %1182 }
 0x373   :  { %v1186_v43 = vsel %vm218_vm7, %v1181_v27, %v1183_v49 }
 0x374   :  { %989 = vrot.lane.b32.xlu1 %v980_v18, %s1673_s27  ;;  %987 = vrot.lane.b32.xlu0 %v979_v20, %s1673_s27  ;;  %v1194_v47 = vmul.f32 %v1186_v43, %v2192_v59 }
 0x376   :  { %v1297_v57 = vpop.permute.xlu0 %1296 }
 0x377   :  { %v1304_v1 = vsel %vm98_vm8, %v1297_v57, %v1299_v61  ;;  %v1311_v12 = vmul.f32 %v1297_v57, %v2178_v51 }
 0x378   :  { %1050 = vrot.lane.b32.xlu1 %v1041_v24, %s1671_s23  ;;  %1048 = vrot.lane.b32.xlu0 %v1040_v26, %s1671_s23  ;;  %v1312_v9 = vmul.f32 %v1304_v1, %v2180_v52 }
 0x37a   :  { %v1301_v63 = vpop.permute.xlu0 %1300 }
 0x37b   :  { %v1305_v5 = vsel %vm98_vm8, %v1299_v61, %v1301_v63  ;;  %v1306_v11 = vsel %vm98_vm8, %v1301_v63, %v1303_v3 }
 0x37c   :  { %993 = vrot.lane.b32.xlu1 %v982_v36, %s1673_s27  ;;  %991 = vrot.lane.b32.xlu0 %v981_v37, %s1673_s27  ;;  %v1313_v10 = vmul.f32 %v1305_v5, %v2196_v62  ;;  %v1314_v15 = vmul.f32 %v1306_v11, %v2192_v59 }
 0x380   :  { %1054 = vrot.lane.b32.xlu1 %v1043_v39, %s1671_s23  ;;  %1052 = vrot.lane.b32.xlu0 %v1042_v40, %s1671_s23 }
 0x384   :  { %1143 = vrot.lane.b32.xlu1 %v1133_v42, %s1670_s20  ;;  %1141 = vrot.lane.b32.xlu0 %v1132_v29, %s1670_s20 }
 0x388   :  { %1145 = vrot.lane.b32.xlu1 %v1134_v44, %s1670_s20  ;;  %1139 = vrot.lane.b32.xlu0 %v1131_v45, %s1670_s20 }
 0x38c   :  { %1203 = vrot.lane.b32.xlu1 %v1193_v53, %s1669_s17  ;;  %1201 = vrot.lane.b32.xlu0 %v1192_v50, %s1669_s17 }
 0x390   :  { %1261 = vrot.lane.b32.xlu0 %v1252_v55, %s1667_s11  ;;  %1263 = vrot.lane.b32.xlu1 %v1253_v56, %s1667_s11 }
 0x394   :  { %1199 = vrot.lane.b32.xlu0 %v1191_v58, %s1669_s17  ;;  %1259 = vrot.lane.b32.xlu1 %v1251_v60, %s1667_s11 }
 0x398   :  { %1205 = vrot.lane.b32.xlu0 %v1194_v47, %s1669_s17  ;;  %1265 = vrot.lane.b32.xlu1 %v1254_v0, %s1667_s11 }
 0x39c   :  { %1323 = vrot.lane.b32.xlu1 %v1313_v10, %s1668_s12  ;;  %1321 = vrot.lane.b32.xlu0 %v1312_v9, %s1668_s12 }
 0x3a0   :  { %1319 = vrot.lane.b32.xlu0 %v1311_v12, %s1668_s12  ;;  %1325 = vrot.lane.b32.xlu1 %v1314_v15, %s1668_s12 }
 0x3d6   :  { %v866_v16 = vpop.permute.xlu0 %865  ;;  %v868_v17 = vpop.permute.xlu1 %867 }
 0x3d7   :  { %881 = vst.msk [vmem:[#allocation3] sm:$0xff] %vm880_vm5, %v866_v16  ;;  %v873_v52 = vsel %vm98_vm8, %v866_v16, %v868_v17 }
 0x3da   :  { %v927_v62 = vpop.permute.xlu0 %926  ;;  %v929_v14 = vpop.permute.xlu1 %928 }
 0x3db   :  { %942 = vst.msk [vmem:[#allocation3 + $0x20] sm:$0xff] %vm941_vm11, %v927_v62  ;;  %v934_v25 = vsel %vm158_vm6, %v927_v62, %v929_v14 }
 0x3dc   :  { %v1619_v18 = vpack.c.bf16 %v934_v25, %v873_v52 }
 0x3de   :  { %v870_v51 = vpop.permute.xlu0 %869  ;;  %v872_v20 = vpop.permute.xlu1 %871  ;;  %1620 = vmatprep.subr.bf16.mxu0 %v1619_v18  ;;  %v1339_v24 = vld [vmem:[#allocation3] sm:$0xff] }
 0x3df   :  { %v874_v59 = vsel %vm98_vm8, %v868_v17, %v870_v51  ;;  %v875_v21 = vsel %vm98_vm8, %v870_v51, %v872_v20  ;;  %vm1063_vm8 = vcmask 1047560  }
 0x3e2   :  { %v931_v23 = vpop.permute.xlu0 %930  ;;  %v933_v22 = vpop.permute.xlu1 %932  ;;  %v1343_v26 = vld [vmem:[#allocation3 + $0x20] sm:$0xff] }
 0x3e3   :  { %v935_v19 = vsel %vm158_vm6, %v929_v14, %v931_v23  ;;  %v936_v35 = vsel %vm158_vm6, %v931_v23, %v933_v22  ;;  %v1621_v36 = vpack.c.bf16 %v1343_v26, %v1339_v24  ;;  %v1338_v23 = vld [vmem:[%s2364_s5] sm:$0xff] }
 0x3e4   :  { %v1635_v37 = vpack.c.bf16 %v936_v35, %v875_v21  ;;  %v1637_v27 = vpack.c.bf16 %v935_v19, %v874_v59 }
 0x3e5   :  { %1622 = vmatpush1.bf16.msra.mxu0 %v1621_v36 }
 0x3e6   :  { %v988_v38 = vpop.permute.xlu0 %987  ;;  %v990_v39 = vpop.permute.xlu1 %989  ;;  %1636 = vmatprep.subr.bf16.mxu1 %v1635_v37 }
 0x3e7   :  { %1003 = vst.msk [vmem:[#allocation3 + $0x40] sm:$0xff] %vm1002_vm12, %v988_v38  ;;  %v995_v40 = vsel %vm218_vm7, %v988_v38, %v990_v39  ;;  %1638 = vmatpush1.bf16.msra.mxu1 %v1637_v27 }
 0x3ea   :  { %v1049_v30 = vpop.permute.xlu0 %1048  ;;  %v1051_v33 = vpop.permute.xlu1 %1050 }
 0x3eb   :  { %1064 = vst.msk [vmem:[#allocation3 + $0x60] sm:$0xff] %vm1063_vm8, %v1049_v30  ;;  %v1056_v41 = vsel %vm278_vm4, %v1049_v30, %v1051_v33 }
 0x3ec   :  { %v1623_v28 = vpack.c.bf16 %v1056_v41, %v995_v40 }
 0x3ee   :  { %v992_v42 = vpop.permute.xlu0 %991  ;;  %v994_v29 = vpop.permute.xlu1 %993  ;;  %1624 = vmatprep.subr.bf16.mxu0 %v1623_v28  ;;  %v1347_v48 = vld [vmem:[#allocation3 + $0x40] sm:$0xff] }
 0x3ef   :  { %v996_v13 = vsel %vm218_vm7, %v990_v39, %v992_v42  ;;  %v997_v32 = vsel %vm218_vm7, %v992_v42, %v994_v29 }
 0x3f2   :  { %v1053_v44 = vpop.permute.xlu0 %1052  ;;  %v1055_v45 = vpop.permute.xlu1 %1054  ;;  %v1351_v31 = vld [vmem:[#allocation3 + $0x60] sm:$0xff] }
 0x3f3   :  { %v1057_v49 = vsel %vm278_vm4, %v1051_v33, %v1053_v44  ;;  %v1058_v50 = vsel %vm278_vm4, %v1053_v44, %v1055_v45  ;;  %v1625_v53 = vpack.c.bf16 %v1351_v31, %v1347_v48  ;;  %v1547_v33 = vld [vmem:[%s2365_s6] sm:$0xff] }
 0x3f4   :  { %v1639_v34 = vpack.c.bf16 %v1058_v50, %v997_v32  ;;  %v1641_v54 = vpack.c.bf16 %v1057_v49, %v996_v13 }
 0x3f5   :  { %1626 = vmatpush1.bf16.msra.mxu0 %v1625_v53 }
 0x3f6   :  { %v1142_v8 = vpop.permute.xlu0 %1141  ;;  %v1144_v55 = vpop.permute.xlu1 %1143  ;;  %1640 = vmatprep.subr.bf16.mxu1 %v1639_v34  ;;  %v1557_v34 = vld [vmem:[%s2366_s7] sm:$0xff] }
 0x3f7   :  { %v1148_v56 = vsel %vm259_vm3, %v1142_v8, %v1144_v55  ;;  %1642 = vmatpush1.bf16.msra.mxu1 %v1641_v54 }
 0x3f8   :  { %v1627_v57 = vpack.c.bf16 %v1148_v56, %v2207_v7 }
 0x3fa   :  { %v1140_v58 = vpop.permute.xlu0 %1139  ;;  %v1146_v60 = vpop.permute.xlu1 %1145  ;;  %1628 = vmatprep.subr.bf16.mxu0 %v1627_v57 }
 0x3fb   :  { %v1147_v61 = vsel %vm259_vm3, %v1140_v58, %v1142_v8  ;;  %v1149_v43 = vsel %vm259_vm3, %v1144_v55, %v1146_v60  ;;  %1157 = vst.msk [vmem:[#allocation3 + $0xb8] sm:$0xff] %vm259_vm3, %v1146_v60  ;;  %vm1375_vm3 = vcmask 588800  }
 0x3fc   :  { %v1629_v46 = vpack.c.bf16 %v1147_v61, %v2215_v4  ;;  %v1645_v10 = vpack.c.bf16 %v1149_v43, %v2218_v6 }
 0x3fe   :  { %v1202_v63 = vpop.permute.xlu0 %1201  ;;  %v1204_v47 = vpop.permute.xlu1 %1203  ;;  %1630 = vmatpush1.bf16.msra.mxu0 %v1629_v46 }
 0x3ff   :  { %v1208_v0 = vsel %vm199_vm2, %v1202_v63, %v1204_v47 }
 0x402   :  { %v1262_v1 = vpop.permute.xlu0 %1261  ;;  %v1264_v5 = vpop.permute.xlu1 %1263  ;;  %v1362_v3 = vld [vmem:[#allocation3 + $0xb8] sm:$0xff] }
 0x403   :  { %v1268_v7 = vsel %vm139_vm1, %v1262_v1, %v1264_v5  ;;  %v1643_v9 = vpack.c.bf16 %v1362_v3, %v2210_v2 }
 0x404   :  { %v1631_v11 = vpack.c.bf16 %v1268_v7, %v1208_v0 }
 0x405   :  { %1644 = vmatprep.subr.bf16.mxu1 %v1643_v9 }
 0x406   :  { %v1200_v12 = vpop.permute.xlu0 %1199  ;;  %1646 = vmatpush1.bf16.msra.mxu1 %v1645_v10  ;;  %v1260_v15 = vpop.permute.xlu1 %1259  ;;  %1632 = vmatprep.subr.bf16.mxu0 %v1631_v11 }
 0x407   :  { %v1207_v4 = vsel %vm199_vm2, %v1200_v12, %v1202_v63  ;;  %v1267_v16 = vsel %vm139_vm1, %v1260_v15, %v1262_v1 }
 0x408   :  { %v1633_v17 = vpack.c.bf16 %v1267_v16, %v1207_v4 }
 0x40a   :  { %v1206_v52 = vpop.permute.xlu0 %1205  ;;  %v1266_v62 = vpop.permute.xlu1 %1265  ;;  %1634 = vmatpush1.bf16.msra.mxu0 %v1633_v17 }
 0x40b   :  { %v1209_v14 = vsel %vm199_vm2, %v1204_v47, %v1206_v52  ;;  %1217 = vst.msk [vmem:[#allocation3 + $0xd8] sm:$0xff] %vm199_vm2, %v1206_v52  ;;  %v1269_v2 = vsel %vm139_vm1, %v1264_v5, %v1266_v62 }
 0x40c   :  { %1277 = vst.msk [vmem:[#allocation3 + $0xf8] sm:$0xff] %vm139_vm1, %v1266_v62  ;;  %v1649_v19 = vpack.c.bf16 %v1269_v2, %v1209_v14 }
 0x40e   :  { %v1322_v6 = vpop.permute.xlu0 %1321  ;;  %v1324_v25 = vpop.permute.xlu1 %1323 }
 0x40f   :  { %v1328_v18 = vsel %vm79_vm0, %v1322_v6, %v1324_v25 }
 0x410   :  { %1395 = vmatprep.subr.mxu0 %v1328_v18 }
 0x412   :  { %v1320_v51 = vpop.permute.xlu0 %1319  ;;  %v1326_v20 = vpop.permute.xlu1 %1325  ;;  %v1366_v59 = vld [vmem:[#allocation3 + $0xd8] sm:$0xff] }
 0x413   :  { %v1370_v21 = vld [vmem:[#allocation3 + $0xf8] sm:$0xff]  ;;  %v1327_v22 = vsel %vm79_vm0, %v1320_v51, %v1322_v6  ;;  %v1329_v24 = vsel %vm79_vm0, %v1324_v25, %v1326_v20  ;;  %1337 = vst.msk [vmem:[#allocation3 + $0x118] sm:$0xff] %vm79_vm0, %v1326_v20 }
 0x414   :  { %v1647_v26 = vpack.c.bf16 %v1370_v21, %v1366_v59  ;;  %1396 = vmatpush1.msra.mxu0 %v1327_v22 }
 0x415   :  { %1601 = vmatmul.mubr.msk.f32.vlgmr.msra.gmra.mrb[2].mxu0 %vm1375_vm3, %v1338_v23 }
 0x416   :  { %1648 = vmatprep.subr.bf16.mxu1 %v1647_v26 }
 0x417   :  { %1650 = vmatpush1.bf16.msra.mxu1 %v1649_v19 }
 0x41a   :  { %v1374_v35 = vld [vmem:[#allocation3 + $0x118] sm:$0xff] }
 0x41b   :  { %1466 = vmatprep.subr.mxu1 %v1374_v35 }
 0x41c   :  { %1467 = vmatpush1.msra.mxu1 %v1329_v24 }
 0x41d   :  { %1602 = vmatmul.mubr.msk.f32.vlgmr.msra.gmra.mrb[2].mxu1 %vm1375_vm3, %v1338_v23 }
 0x4e8   :  { %v1445_v36 = vpop.f32.mrb[2].mxu0 }
 0x4e9   :  { %v1447_v37 = vpop.f32.mrb[3].mxu0 }
 0x4ea   :  { %v1521_v27 = vadd.f32 %v1447_v37, %v1445_v36 }
 0x4f0   :  { %v1516_v38 = vpop.f32.mrb[2].mxu1 }
 0x4f1   :  { %v1522_v39 = vadd.f32 %v1521_v27, %v1516_v38  ;;  %v1518_v40 = vpop.f32.mrb[3].mxu1 }
 0x4f3   :  { %v1523_v30 = vadd.f32 %v1522_v39, %v1518_v40 }
 0x4f5   :  { %1524 = vadd.xlane.f32.xlu0 %v1523_v30 }
 0x50b   :  { %1550 = vperm.xlu0 %1661, %v1547_v33  }
 0x582   :  { %v1525_v41 = vpop.xlane.xlu0 %1524 }
 0x583   :  { %v1526_v28 = vmul.f32 0.001953125, %v1525_v41 }
 0x585   :  { %v1527_v42 = vsub.f32 %v1445_v36, %v1526_v28  ;;  %v1528_v29 = vsub.f32 %v1447_v37, %v1526_v28  ;;  %v1529_v13 = vsub.f32 %v1516_v38, %v1526_v28  ;;  %v1530_v32 = vsub.f32 %v1518_v40, %v1526_v28 }
 0x587   :  { %v1531_v44 = vmul.f32 %v1527_v42, %v1527_v42  ;;  %v1532_v45 = vmul.f32 %v1528_v29, %v1528_v29  ;;  %v1533_v48 = vmul.f32 %v1529_v13, %v1529_v13  ;;  %v1534_v49 = vmul.f32 %v1530_v32, %v1530_v32 }
 0x589   :  { %v1535_v31 = vadd.f32 %v1532_v45, %v1531_v44 }
 0x58a   :  { %v1551_v43 = vpop.permute.xlu0 %1550 }
 0x58b   :  { %v1536_v50 = vadd.f32 %v1535_v31, %v1533_v48 }
 0x58d   :  { %v1537_v53 = vadd.f32 %v1536_v50, %v1534_v49 }
 0x58f   :  { %1538 = vadd.xlane.f32.xlu1 %v1537_v53 }
 0x5a0   :  { %1560 = vperm.xlu1 %1662, %v1557_v34  }
 0x61c   :  { %v1539_v54 = vpop.xlane.xlu1 %1538 }
 0x61d   :  { %v1540_v8 = vmul.f32 0.001953125, %v1539_v54 }
 0x61f   :  { %v1541_v55 = vadd.f32 1e-05, %v1540_v8 }
 0x620   :  { %v1561_v1 = vpop.permute.xlu1 %1560 }
 0x621   :  { %1665 = vrsqrt.f32 %v1541_v55 }
 0x62b   :  { %v1666_v56 = vpop.eup %1665 }
 0x62c   :  { %v1543_v57 = vmul.f32 %v1666_v56, %v1527_v42  ;;  %v1544_v58 = vmul.f32 %v1666_v56, %v1528_v29  ;;  %v1545_v60 = vmul.f32 %v1666_v56, %v1529_v13  ;;  %v1546_v61 = vmul.f32 %v1666_v56, %v1530_v32 }
 0x62e   :  { %v1553_v46 = vmul.f32 %v1551_v43, %v1543_v57  ;;  %v1554_v63 = vmul.f32 %v1551_v43, %v1544_v58  ;;  %v1555_v47 = vmul.f32 %v1551_v43, %v1545_v60  ;;  %v1556_v0 = vmul.f32 %v1551_v43, %v1546_v61 }
 0x630   :  { %v1563_v5 = vadd.f32 %v1561_v1, %v1553_v46  ;;  %v1564_v3 = vadd.f32 %v1561_v1, %v1554_v63  ;;  %v1565_v7 = vadd.f32 %v1561_v1, %v1555_v47  ;;  %v1566_v9 = vadd.f32 %v1561_v1, %v1556_v0 }
 0x632   :  { %v1567_v10 = vmax.f32 %v1563_v5, 0.0  ;;  %v1568_v11 = vmax.f32 %v1564_v3, 0.0  ;;  %v1569_v12 = vmax.f32 %v1565_v7, 0.0  ;;  %v1570_v15 = vmax.f32 %v1566_v9, 0.0 }
 0x634   :  { %1571 = vst [vmem:[%s2367_s8] sm:$0xff] %v1567_v10  ;;  %1572 = vst [vmem:[%s2367_s8 + $0x8] sm:$0xff] %v1568_v11 }
 0x635   :  { %1573 = vst [vmem:[%s2367_s8 + $0x10] sm:$0xff] %v1569_v12  ;;  %1574 = vst [vmem:[%s2367_s8 + $0x18] sm:$0xff] %v1570_v15 }

</bundles_post_ra>
